<compile_context>
chip_gen: v7x
topology: tpu7x:2x2x1
jax: 0.10.0
libtpu: 0.0.40
codegen_flags: <defaults>
</compile_context>

<pallas_src>
import functools

import jax
import jax.numpy as jnp
from jax.experimental import pallas as pl
from jax.experimental.pallas import tpu as pltpu


# --------------------------------------------------------------------------
# Tiling / VMEM helpers
# --------------------------------------------------------------------------

def _vmem_limit_bytes():
    """Generation-aware scoped-VMEM budget (leave headroom for double buffers)."""
    try:
        info = pltpu.get_tpu_info()
        cap = getattr(info, "vmem_capacity_bytes", None)
        if cap:
            return int(min(cap * 3 // 4, 100 * 1024 * 1024))
    except Exception:
        pass
    return 64 * 1024 * 1024


_VMEM_LIMIT = _vmem_limit_bytes()


def _pick_tile(n, target=512):
    """Row tile: whole thing if small; else the largest multiple-of-8 divisor of
    n that is <= target; else `target` (remainder tile handled by block clip)."""
    if n <= target:
        return n
    t0 = target - (target % 8)
    for t in range(t0, 7, -8):
        if n % t == 0:
            return t
    return max(t0, 8)


def _pick_row_tile(H, W, target_rows=512):
    """Conv row tile th: must divide H and keep th*W a multiple of 8."""
    if H * W <= target_rows:
        return H
    cap = max(1, target_rows // max(W, 1))
    for th in range(min(H, cap), 0, -1):
        if H % th == 0 and (th * W) % 8 == 0:
            return th
    return H


# --------------------------------------------------------------------------
# Merged sem|geo 3x3 'same' conv: 9 accumulated matmuls, path-stacked output.
# --------------------------------------------------------------------------

def _conv3x3_kernel(xp_ref, w_ref, b_ref, o_ref, *, th, W, tiled, bf16):
    # xp_ref: [H+2, W+2, Cin]  zero-padded plane (resident once per batch idx)
    # w_ref : [9, Cin, 2*Cr]   taps (dy-major), sem|geo merged along Cout
    # b_ref : [2, 1, Cr]
    # o_ref : [2, th*W, Cr]    (path, rows, channels)
    if tiled:
        r0 = pl.multiple_of(pl.program_id(1) * th, th)
        x = xp_ref[pl.ds(r0, th + 2)]
    else:
        x = xp_ref[...]
    cin = x.shape[-1]
    cout2 = w_ref.shape[-1]
    cr = cout2 // 2
    acc = jnp.zeros((th * W, cout2), jnp.float32)
    t = 0
    for dy in range(3):                       # static unroll: 9 tap matmuls
        for dx in range(3):
            tap = x[dy:dy + th, dx:dx + W, :].reshape(th * W, cin)
            wt = w_ref[t]
            if bf16:
                tap = tap.astype(jnp.bfloat16)
                wt = wt.astype(jnp.bfloat16)
            acc = acc + jnp.dot(tap, wt, preferred_element_type=jnp.float32)
            t += 1
    o_ref[0, :, :] = (acc[:, :cr] + b_ref[0]).astype(o_ref.dtype)
    o_ref[1, :, :] = (acc[:, cr:] + b_ref[1]).astype(o_ref.dtype)


def conv3x3_paths(x_nhwc, w_sem, b_sem, w_geo, b_geo, *, bf16=False):
    """x: [B,H,W,Cin]; w_*: [3,3,Cin,Cr] (HWIO); returns [2, B, H*W, Cr]."""
    B, H, W, Cin = x_nhwc.shape
    Cr = w_sem.shape[-1]
    # TODO(synk): for very large planes, read halo rows straight from the
    # unpadded array inside the kernel instead of this XLA-side pad.
    xp = jnp.pad(x_nhwc, ((0, 0), (1, 1), (1, 1), (0, 0)))      # Conv2d(pad=1)
    w9 = jnp.concatenate([w_sem, w_geo], axis=-1).reshape(9, Cin, 2 * Cr)
    b2 = jnp.stack([b_sem, b_geo]).reshape(2, 1, Cr)
    th = _pick_row_tile(H, W)
    n_tiles = H // th
    cost = pl.CostEstimate(
        flops=2 * B * H * W * 9 * Cin * 2 * Cr,
        transcendentals=0,
        bytes_accessed=4 * (B * (H + 2) * (W + 2) * Cin + 9 * Cin * 2 * Cr
                            + 2 * B * H * W * Cr))
    return pl.pallas_call(
        functools.partial(_conv3x3_kernel, th=th, W=W, tiled=(th < H), bf16=bf16),
        out_shape=jax.ShapeDtypeStruct((2, B, H * W, Cr), x_nhwc.dtype),
        grid=(B, n_tiles),
        in_specs=[
            pl.BlockSpec((None, H + 2, W + 2, Cin), lambda b, i: (b, 0, 0, 0)),
            pl.BlockSpec((9, Cin, 2 * Cr), lambda b, i: (0, 0, 0)),
            pl.BlockSpec((2, 1, Cr), lambda b, i: (0, 0, 0)),
        ],
        out_specs=pl.BlockSpec((2, None, th * W, Cr), lambda b, i: (0, b, i, 0)),
        compiler_params=pltpu.CompilerParams(
            dimension_semantics=("parallel", "arbitrary"),
            vmem_limit_bytes=_VMEM_LIMIT),
        cost_estimate=cost,
    )(xp, w9, b2)


# --------------------------------------------------------------------------
# 1x1 conv == row-tiled matmul over channels (value projection).
# --------------------------------------------------------------------------

def _linear_kernel(x_ref, w_ref, b_ref, o_ref, *, bf16):
    x = x_ref[...]
    w = w_ref[...]
    if bf16:
        x = x.astype(jnp.bfloat16)
        w = w.astype(jnp.bfloat16)
    o_ref[...] = (jnp.dot(x, w, preferred_element_type=jnp.float32)
                  + b_ref[...]).astype(o_ref.dtype)


def linear(x2d, w, b, *, bf16=False):
    M, Cin = x2d.shape
    Cout = w.shape[-1]
    tm = _pick_tile(M, 512)
    return pl.pallas_call(
        functools.partial(_linear_kernel, bf16=bf16),
        out_shape=jax.ShapeDtypeStruct((M, Cout), x2d.dtype),
        grid=(pl.cdiv(M, tm),),
        in_specs=[
            pl.BlockSpec((tm, Cin), lambda i: (i, 0)),
            pl.BlockSpec((Cin, Cout), lambda i: (0, 0)),
            pl.BlockSpec((1, Cout), lambda i: (0, 0)),
        ],
        out_specs=pl.BlockSpec((tm, Cout), lambda i: (i, 0)),
        compiler_params=pltpu.CompilerParams(
            dimension_semantics=("parallel",),
            vmem_limit_bytes=_VMEM_LIMIT),
    )(x2d, w, b.reshape(1, Cout))


# --------------------------------------------------------------------------
# Attention: softmax(scale * q @ k^T) @ v.
# One pallas_call covers both (sem, geo) paths and all heads via grid axes.
# --------------------------------------------------------------------------

def _attn_kernel(q_ref, k_ref, v_ref, *out_refs, scale, numhead, d_qk, d_v,
                 with_attn, bf16):
    if with_attn:
        attn_ref, out_ref = out_refs
    else:
        (out_ref,) = out_refs
    if numhead > 1:
        n = pl.program_id(2)
        q = q_ref[:, pl.ds(n * d_qk, d_qk)]
        k = k_ref[:, pl.ds(n * d_qk, d_qk)]
        v = v_ref[:, pl.ds(n * d_v, d_v)]
    else:
        q, k, v = q_ref[...], k_ref[...], v_ref[...]
    q = q.astype(jnp.float32) * scale
    k = k.astype(jnp.float32)
    qm, km = (q.astype(jnp.bfloat16), k.astype(jnp.bfloat16)) if bf16 else (q, k)
    energy = jax.lax.dot_general(qm, km, (((1,), (1,)), ((), ())),
                                 preferred_element_type=jnp.float32)   # [tq, Lk]
    m = jnp.max(energy, axis=-1, keepdims=True)
    e = jnp.exp(energy - m)
    attn = e / jnp.sum(e, axis=-1, keepdims=True)
    if with_attn:
        attn_ref[...] = attn.astype(attn_ref.dtype)
    pv = attn.astype(jnp.bfloat16) if bf16 else attn
    vv = v.astype(jnp.bfloat16) if bf16 else v.astype(jnp.float32)
    out_ref[...] = jnp.dot(pv, vv,
                           preferred_element_type=jnp.float32).astype(out_ref.dtype)


def attention_paths(q_all, k_all, v3d, *, numhead, scale, return_attention, bf16):
    """q_all/k_all: [2, B, Lq|Lk, Cr]; v3d: [B, Lk, Cv].
    Returns (attn [2,B,numhead,Lq,Lk] f32 or None, r [2,B,numhead,Lq,d_v])."""
    _, B, Lq, Cr = q_all.shape
    Lk = k_all.shape[2]
    Cv = v3d.shape[-1]
    d_qk = Cr // numhead
    d_v = Cv // numhead
    tq = _pick_tile(Lq, 512)                   # bounds the f32 energy tile
    grid = (2, B, numhead, pl.cdiv(Lq, tq))
    in_specs = [
        pl.BlockSpec((None, None, tq, Cr), lambda p, b, n, i: (p, b, i, 0)),
        pl.BlockSpec((None, None, Lk, Cr), lambda p, b, n, i: (p, b, 0, 0)),
        pl.BlockSpec((None, Lk, Cv), lambda p, b, n, i: (b, 0, 0)),
    ]
    r_spec = pl.BlockSpec((None, None, None, tq, d_v),
                          lambda p, b, n, i: (p, b, n, i, 0))
    r_shape = jax.ShapeDtypeStruct((2, B, numhead, Lq, d_v), q_all.dtype)
    cost = pl.CostEstimate(
        flops=2 * 2 * B * numhead * Lq * Lk * (d_qk + d_v),
        transcendentals=2 * B * numhead * Lq * Lk,
        bytes_accessed=4 * (2 * B * Lq * Cr + 2 * B * Lk * Cr + B * Lk * Cv
                            + 2 * B * Lq * Cv
                            + (2 * B * numhead * Lq * Lk if return_attention else 0)))
    cp = pltpu.CompilerParams(
        dimension_semantics=("parallel", "parallel", "parallel", "arbitrary"),
        vmem_limit_bytes=_VMEM_LIMIT)
    kern = functools.partial(_attn_kernel, scale=scale, numhead=numhead,
                             d_qk=d_qk, d_v=d_v,
                             with_attn=return_attention, bf16=bf16)
    # TODO(synk): for long sequences, add an Lk grid axis with online softmax
    # (flash-style m/l/acc scratch) instead of holding full-length K/V blocks.
    if return_attention:
        attn, r = pl.pallas_call(
            kern,
            out_shape=(jax.ShapeDtypeStruct((2, B, numhead, Lq, Lk), jnp.float32),
                       r_shape),
            grid=grid, in_specs=in_specs,
            out_specs=(pl.BlockSpec((None, None, None, tq, Lk),
                                    lambda p, b, n, i: (p, b, n, i, 0)),
                       r_spec),
            compiler_params=cp, cost_estimate=cost,
        )(q_all, k_all, v3d)
        return attn, r
    r = pl.pallas_call(
        kern, out_shape=r_shape, grid=grid, in_specs=in_specs, out_specs=r_spec,
        compiler_params=cp, cost_estimate=cost,
    )(q_all, k_all, v3d)
    return None, r


# --------------------------------------------------------------------------
# Fused (per path): output 1x1 conv + bias + residual add + LayerNorm (eps=1e-5).
# --------------------------------------------------------------------------

def _proj_res_ln_kernel(r_ref, res_ref, w_ref, b_ref, g_ref, bt_ref, o_ref, *, bf16):
    r = r_ref[...]
    w = w_ref[...]
    if bf16:
        r = r.astype(jnp.bfloat16)
        w = w.astype(jnp.bfloat16)
    proj = jnp.dot(r, w, preferred_element_type=jnp.float32) + b_ref[...]
    x = res_ref[...].astype(jnp.float32) + proj
    # single-pass LayerNorm stats: var = E[x^2] - mean^2
    mean = jnp.mean(x, axis=-1, keepdims=True)
    msq = jnp.mean(x * x, axis=-1, keepdims=True)
    var = msq - mean * mean
    y = (x - mean) * jax.lax.rsqrt(var + 1e-5)
    o_ref[...] = (y * g_ref[...] + bt_ref[...]).astype(o_ref.dtype)


def out_proj_residual_ln(r_all, view3d, w2, b2, g2, bt2, *, bf16=False):
    """r_all: [2,B,L,C]; view3d: [B,L,C]; w2: [2,C,C]; b2/g2/bt2: [2,1,C].
    Returns [2, B, L, C]."""
    _, B, L, C = r_all.shape
    tm = _pick_tile(L, 512)
    grid = (2, B, pl.cdiv(L, tm))
    return pl.pallas_call(
        functools.partial(_proj_res_ln_kernel, bf16=bf16),
        out_shape=jax.ShapeDtypeStruct((2, B, L, C), view3d.dtype),
        grid=grid,
        in_specs=[
            pl.BlockSpec((None, None, tm, C), lambda p, b, i: (p, b, i, 0)),
            pl.BlockSpec((None, tm, C), lambda p, b, i: (b, i, 0)),
            pl.BlockSpec((None, C, C), lambda p, b, i: (p, 0, 0)),
            pl.BlockSpec((None, 1, C), lambda p, b, i: (p, 0, 0)),
            pl.BlockSpec((None, 1, C), lambda p, b, i: (p, 0, 0)),
            pl.BlockSpec((None, 1, C), lambda p, b, i: (p, 0, 0)),
        ],
        out_specs=pl.BlockSpec((None, None, tm, C), lambda p, b, i: (p, b, i, 0)),
        compiler_params=pltpu.CompilerParams(
            dimension_semantics=("parallel", "parallel", "parallel"),
            vmem_limit_bytes=_VMEM_LIMIT),
    )(r_all, view3d, w2, b2, g2, bt2)


# --------------------------------------------------------------------------
# Module: parameters + forward
# --------------------------------------------------------------------------

def init_params(key, input_channels, reduction_ratio=2):
    C = input_channels
    Cr = C // reduction_ratio
    ks = jax.random.split(key, 14)

    def nrm(k, shape, s=0.1):
        return jax.random.normal(k, shape, jnp.float32) * s

    return {
        # 3x3 convs, HWIO layout (torch weight permuted (2,3,1,0))
        'q_sem_w': nrm(ks[0], (3, 3, C, Cr)), 'q_sem_b': nrm(ks[1], (Cr,)),
        'q_geo_w': nrm(ks[2], (3, 3, C, Cr)), 'q_geo_b': nrm(ks[3], (Cr,)),
        'k_sem_w': nrm(ks[4], (3, 3, C, Cr)), 'k_sem_b': nrm(ks[5], (Cr,)),
        'k_geo_w': nrm(ks[6], (3, 3, C, Cr)), 'k_geo_b': nrm(ks[7], (Cr,)),
        # 1x1 convs as [Cin, Cout] matrices
        'v_w': nrm(ks[8], (C, C)), 'v_b': nrm(ks[9], (C,)),
        'out_sem_w': nrm(ks[10], (C, C)), 'out_sem_b': nrm(ks[11], (C,)),
        'out_geo_w': nrm(ks[12], (C, C)), 'out_geo_b': nrm(ks[13], (C,)),
        # LayerNorm affine params (torch default init: ones / zeros)
        'sem_gamma': jnp.ones((C,), jnp.float32), 'sem_beta': jnp.zeros((C,), jnp.float32),
        'geo_gamma': jnp.ones((C,), jnp.float32), 'geo_beta': jnp.zeros((C,), jnp.float32),
    }


def conv_attention_decouple(params, query, key_feat, value,
                            q_pos_emb=None, k_pos_emb=None, numhead=1,
                            return_attention=True, use_bf16_matmul=False):
    """Forward pass of ConvAttentionLayer_Decouple.

    query/key_feat/value: [B, C, H, W] (NCHW).
    Returns ([out_sem, out_geo] each [HW, B, C],
             [attn_sem, attn_geo] each [B*numhead, HW_q, HW_kv]).
    """
    B, C, Hq, Wq = query.shape
    Lq = Hq * Wq
    bf16 = use_bf16_matmul

    def to_nhwc(x):
        return jnp.transpose(x, (0, 2, 3, 1))

    # residual (`view`) is the query BEFORE positional encoding is added
    view3d = to_nhwc(query).reshape(B, Lq, C)
    q_in = query if q_pos_emb is None else query + q_pos_emb
    k_in = key_feat if k_pos_emb is None else key_feat + k_pos_emb
    q_nhwc, k_nhwc, v_nhwc = to_nhwc(q_in), to_nhwc(k_in), to_nhwc(value)

    Cr = params['q_sem_w'].shape[-1]

    # merged sem|geo 3x3 convs -> path-stacked [2, B, L, Cr]
    q_all = conv3x3_paths(q_nhwc, params['q_sem_w'], params['q_sem_b'],
                          params['q_geo_w'], params['q_geo_b'], bf16=bf16)
    k_all = conv3x3_paths(k_nhwc, params['k_sem_w'], params['k_sem_b'],
                          params['k_geo_w'], params['k_geo_b'], bf16=bf16)

    Bv, Hv, Wv, Cv = v_nhwc.shape
    Lk = Hv * Wv
    v3d = linear(v_nhwc.reshape(Bv * Lk, Cv), params['v_w'], params['v_b'],
                 bf16=bf16).reshape(Bv, Lk, Cv)

    scaling = float(Cr // numhead) ** (-0.5)       # == self.head_dim ** -0.5

    attn, r = attention_paths(q_all, k_all, v3d, numhead=numhead, scale=scaling,
                              return_attention=return_attention, bf16=bf16)
    if numhead == 1:
        r_all = r.reshape(2, B, Lq, Cv)
    else:  # merge heads: [2, B, n, L, d] -> [2, B, L, n*d]
        r_all = jnp.transpose(r, (0, 1, 3, 2, 4)).reshape(2, B, Lq, Cv)

    w2 = jnp.stack([params['out_sem_w'], params['out_geo_w']])          # [2,C,C]
    b2 = jnp.stack([params['out_sem_b'], params['out_geo_b']]).reshape(2, 1, C)
    g2 = jnp.stack([params['sem_gamma'], params['geo_gamma']]).reshape(2, 1, C)
    bt2 = jnp.stack([params['sem_beta'], params['geo_beta']]).reshape(2, 1, C)

    # fused per-path: out 1x1 conv + bias + residual + LayerNorm
    y_all = out_proj_residual_ln(r_all, view3d, w2, b2, g2, bt2, bf16=bf16)

    # TODO(synk): fold this [B,L,C] -> [L,B,C] permute into the proj+LN
    # out_specs once sub-full second-minor output blocks are validated.
    outputs = [jnp.transpose(y_all[p], (1, 0, 2)) for p in range(2)]

    if return_attention:
        Lka = attn.shape[-1]
        attn = attn.reshape(2, B * numhead, Lq, Lka)
        attentions = [attn[0], attn[1]]
    else:
        attentions = [None, None]
    return outputs, attentions


# --------------------------------------------------------------------------

if __name__ == "__main__":
    B, C, H, W = 2, 8, 16, 16        # input_channels=8, reduction_ratio=2
    numhead = 1

    root = jax.random.PRNGKey(0)
    kq, kk, kv, kp = jax.random.split(root, 4)
    query = jax.random.normal(kq, (B, C, H, W), jnp.float32)
    key_feat = jax.random.normal(kk, (B, C, H, W), jnp.float32)
    value = jax.random.normal(kv, (B, C, H, W), jnp.float32)

    params = init_params(kp, C, reduction_ratio=2)

    outputs, attentions = conv_attention_decouple(
        params, query, key_feat, value, q_pos_emb=None, k_pos_emb=None,
        numhead=numhead, return_attention=True)

    jax.block_until_ready(outputs)
    jax.block_until_ready(attentions)

    assert outputs[0].shape == (H * W, B, C) and outputs[1].shape == (H * W, B, C)
    assert attentions[0].shape == (B * numhead, H * W, H * W)
    assert attentions[1].shape == (B * numhead, H * W, H * W)
    assert bool(jnp.isfinite(outputs[0]).all()) and bool(jnp.isfinite(outputs[1]).all())

    print("KERNEL_OK")
</pallas_src>

<mosaic_0001>
module attributes {stable_mosaic.version = 11 : i64} {
  func.func @_conv3x3_kernel(%arg0: i32, %arg1: i32, %arg2: memref<1x18x18x8xf32, #tpu.memory_space<vmem>>, %arg3: memref<9x8x8xf32, #tpu.memory_space<vmem>>, %arg4: memref<2x1x4xf32, #tpu.memory_space<vmem>>, %arg5: memref<2x1x256x4xf32, #tpu.memory_space<vmem>>) attributes {dimension_semantics = [#tpu.dimension_semantics<parallel>, #tpu.dimension_semantics<arbitrary>], iteration_bounds = array<i64: 2, 1>, scalar_prefetch = 0 : i64, scratch_operands = 0 : i64, tpu.core_type = #tpu.core_type<tc>, window_params = [{transform_indices = @transform_0, window_bounds = array<i64: 1, 18, 18, 8>}, {pipeline_mode = #tpu.pipeline_mode<synchronous>, transform_indices = @transform_1, window_bounds = array<i64: 9, 8, 8>}, {pipeline_mode = #tpu.pipeline_mode<synchronous>, transform_indices = @transform_2, window_bounds = array<i64: 2, 1, 4>}, {transform_indices = @transform_3, window_bounds = array<i64: 2, 1, 256, 4>}]} {
    %c0 = arith.constant 0 : index
    %c0_0 = arith.constant 0 : index
    %c0_1 = arith.constant 0 : index
    %c0_2 = arith.constant 0 : index
    %0 = vector.load %arg2[%c0, %c0_0, %c0_1, %c0_2] : memref<1x18x18x8xf32, #tpu.memory_space<vmem>>, vector<1x18x18x8xf32>
    %1 = vector.shape_cast %0 : vector<1x18x18x8xf32> to vector<18x18x8xf32>
    %cst = arith.constant 0.000000e+00 : f32
    %2 = vector.broadcast %cst : f32 to vector<256x8xf32>
    %3 = vector.extract_strided_slice %1 {offsets = [0, 0, 0], sizes = [16, 16, 8], strides = [1, 1, 1]} : vector<18x18x8xf32> to vector<16x16x8xf32>
    %4 = vector.shape_cast %3 : vector<16x16x8xf32> to vector<256x8xf32>
    %c0_3 = arith.constant 0 : index
    %c0_4 = arith.constant 0 : index
    %c0_5 = arith.constant 0 : index
    %5 = vector.load %arg3[%c0_3, %c0_4, %c0_5] : memref<9x8x8xf32, #tpu.memory_space<vmem>>, vector<1x8x8xf32>
    %6 = vector.shape_cast %5 : vector<1x8x8xf32> to vector<8x8xf32>
    %cst_6 = arith.constant dense<0.000000e+00> : vector<256x8xf32>
    %7 = tpu.matmul %4, %6, %cst_6 {dimension_numbers = #tpu.dot_dimension_numbers<[1], [0], [0], [1], [0, 0, 1, 1], [], []>} : vector<256x8xf32>, vector<8x8xf32>, vector<256x8xf32> -> vector<256x8xf32>
    %8 = arith.addf %2, %7 : vector<256x8xf32>
    %9 = vector.extract_strided_slice %1 {offsets = [0, 1, 0], sizes = [16, 16, 8], strides = [1, 1, 1]} : vector<18x18x8xf32> to vector<16x16x8xf32>
    %10 = vector.shape_cast %9 : vector<16x16x8xf32> to vector<256x8xf32>
    %c1 = arith.constant 1 : index
    %c0_7 = arith.constant 0 : index
    %c0_8 = arith.constant 0 : index
    %11 = vector.load %arg3[%c1, %c0_7, %c0_8] : memref<9x8x8xf32, #tpu.memory_space<vmem>>, vector<1x8x8xf32>
    %12 = vector.shape_cast %11 : vector<1x8x8xf32> to vector<8x8xf32>
    %cst_9 = arith.constant dense<0.000000e+00> : vector<256x8xf32>
    %13 = tpu.matmul %10, %12, %cst_9 {dimension_numbers = #tpu.dot_dimension_numbers<[1], [0], [0], [1], [0, 0, 1, 1], [], []>} : vector<256x8xf32>, vector<8x8xf32>, vector<256x8xf32> -> vector<256x8xf32>
    %14 = arith.addf %8, %13 : vector<256x8xf32>
    %15 = vector.extract_strided_slice %1 {offsets = [0, 2, 0], sizes = [16, 16, 8], strides = [1, 1, 1]} : vector<18x18x8xf32> to vector<16x16x8xf32>
    %16 = vector.shape_cast %15 : vector<16x16x8xf32> to vector<256x8xf32>
    %c2 = arith.constant 2 : index
    %c0_10 = arith.constant 0 : index
    %c0_11 = arith.constant 0 : index
    %17 = vector.load %arg3[%c2, %c0_10, %c0_11] : memref<9x8x8xf32, #tpu.memory_space<vmem>>, vector<1x8x8xf32>
    %18 = vector.shape_cast %17 : vector<1x8x8xf32> to vector<8x8xf32>
    %cst_12 = arith.constant dense<0.000000e+00> : vector<256x8xf32>
    %19 = tpu.matmul %16, %18, %cst_12 {dimension_numbers = #tpu.dot_dimension_numbers<[1], [0], [0], [1], [0, 0, 1, 1], [], []>} : vector<256x8xf32>, vector<8x8xf32>, vector<256x8xf32> -> vector<256x8xf32>
    %20 = arith.addf %14, %19 : vector<256x8xf32>
    %21 = vector.extract_strided_slice %1 {offsets = [1, 0, 0], sizes = [16, 16, 8], strides = [1, 1, 1]} : vector<18x18x8xf32> to vector<16x16x8xf32>
    %22 = vector.shape_cast %21 : vector<16x16x8xf32> to vector<256x8xf32>
    %c3 = arith.constant 3 : index
    %c0_13 = arith.constant 0 : index
    %c0_14 = arith.constant 0 : index
    %23 = vector.load %arg3[%c3, %c0_13, %c0_14] : memref<9x8x8xf32, #tpu.memory_space<vmem>>, vector<1x8x8xf32>
    %24 = vector.shape_cast %23 : vector<1x8x8xf32> to vector<8x8xf32>
    %cst_15 = arith.constant dense<0.000000e+00> : vector<256x8xf32>
    %25 = tpu.matmul %22, %24, %cst_15 {dimension_numbers = #tpu.dot_dimension_numbers<[1], [0], [0], [1], [0, 0, 1, 1], [], []>} : vector<256x8xf32>, vector<8x8xf32>, vector<256x8xf32> -> vector<256x8xf32>
    %26 = arith.addf %20, %25 : vector<256x8xf32>
    %27 = vector.extract_strided_slice %1 {offsets = [1, 1, 0], sizes = [16, 16, 8], strides = [1, 1, 1]} : vector<18x18x8xf32> to vector<16x16x8xf32>
    %28 = vector.shape_cast %27 : vector<16x16x8xf32> to vector<256x8xf32>
    %c4 = arith.constant 4 : index
    %c0_16 = arith.constant 0 : index
    %c0_17 = arith.constant 0 : index
    %29 = vector.load %arg3[%c4, %c0_16, %c0_17] : memref<9x8x8xf32, #tpu.memory_space<vmem>>, vector<1x8x8xf32>
    %30 = vector.shape_cast %29 : vector<1x8x8xf32> to vector<8x8xf32>
    %cst_18 = arith.constant dense<0.000000e+00> : vector<256x8xf32>
    %31 = tpu.matmul %28, %30, %cst_18 {dimension_numbers = #tpu.dot_dimension_numbers<[1], [0], [0], [1], [0, 0, 1, 1], [], []>} : vector<256x8xf32>, vector<8x8xf32>, vector<256x8xf32> -> vector<256x8xf32>
    %32 = arith.addf %26, %31 : vector<256x8xf32>
    %33 = vector.extract_strided_slice %1 {offsets = [1, 2, 0], sizes = [16, 16, 8], strides = [1, 1, 1]} : vector<18x18x8xf32> to vector<16x16x8xf32>
    %34 = vector.shape_cast %33 : vector<16x16x8xf32> to vector<256x8xf32>
    %c5 = arith.constant 5 : index
    %c0_19 = arith.constant 0 : index
    %c0_20 = arith.constant 0 : index
    %35 = vector.load %arg3[%c5, %c0_19, %c0_20] : memref<9x8x8xf32, #tpu.memory_space<vmem>>, vector<1x8x8xf32>
    %36 = vector.shape_cast %35 : vector<1x8x8xf32> to vector<8x8xf32>
    %cst_21 = arith.constant dense<0.000000e+00> : vector<256x8xf32>
    %37 = tpu.matmul %34, %36, %cst_21 {dimension_numbers = #tpu.dot_dimension_numbers<[1], [0], [0], [1], [0, 0, 1, 1], [], []>} : vector<256x8xf32>, vector<8x8xf32>, vector<256x8xf32> -> vector<256x8xf32>
    %38 = arith.addf %32, %37 : vector<256x8xf32>
    %39 = vector.extract_strided_slice %1 {offsets = [2, 0, 0], sizes = [16, 16, 8], strides = [1, 1, 1]} : vector<18x18x8xf32> to vector<16x16x8xf32>
    %40 = vector.shape_cast %39 : vector<16x16x8xf32> to vector<256x8xf32>
    %c6 = arith.constant 6 : index
    %c0_22 = arith.constant 0 : index
    %c0_23 = arith.constant 0 : index
    %41 = vector.load %arg3[%c6, %c0_22, %c0_23] : memref<9x8x8xf32, #tpu.memory_space<vmem>>, vector<1x8x8xf32>
    %42 = vector.shape_cast %41 : vector<1x8x8xf32> to vector<8x8xf32>
    %cst_24 = arith.constant dense<0.000000e+00> : vector<256x8xf32>
    %43 = tpu.matmul %40, %42, %cst_24 {dimension_numbers = #tpu.dot_dimension_numbers<[1], [0], [0], [1], [0, 0, 1, 1], [], []>} : vector<256x8xf32>, vector<8x8xf32>, vector<256x8xf32> -> vector<256x8xf32>
    %44 = arith.addf %38, %43 : vector<256x8xf32>
    %45 = vector.extract_strided_slice %1 {offsets = [2, 1, 0], sizes = [16, 16, 8], strides = [1, 1, 1]} : vector<18x18x8xf32> to vector<16x16x8xf32>
    %46 = vector.shape_cast %45 : vector<16x16x8xf32> to vector<256x8xf32>
    %c7 = arith.constant 7 : index
    %c0_25 = arith.constant 0 : index
    %c0_26 = arith.constant 0 : index
    %47 = vector.load %arg3[%c7, %c0_25, %c0_26] : memref<9x8x8xf32, #tpu.memory_space<vmem>>, vector<1x8x8xf32>
    %48 = vector.shape_cast %47 : vector<1x8x8xf32> to vector<8x8xf32>
    %cst_27 = arith.constant dense<0.000000e+00> : vector<256x8xf32>
    %49 = tpu.matmul %46, %48, %cst_27 {dimension_numbers = #tpu.dot_dimension_numbers<[1], [0], [0], [1], [0, 0, 1, 1], [], []>} : vector<256x8xf32>, vector<8x8xf32>, vector<256x8xf32> -> vector<256x8xf32>
    %50 = arith.addf %44, %49 : vector<256x8xf32>
    %51 = vector.extract_strided_slice %1 {offsets = [2, 2, 0], sizes = [16, 16, 8], strides = [1, 1, 1]} : vector<18x18x8xf32> to vector<16x16x8xf32>
    %52 = vector.shape_cast %51 : vector<16x16x8xf32> to vector<256x8xf32>
    %c8 = arith.constant 8 : index
    %c0_28 = arith.constant 0 : index
    %c0_29 = arith.constant 0 : index
    %53 = vector.load %arg3[%c8, %c0_28, %c0_29] : memref<9x8x8xf32, #tpu.memory_space<vmem>>, vector<1x8x8xf32>
    %54 = vector.shape_cast %53 : vector<1x8x8xf32> to vector<8x8xf32>
    %cst_30 = arith.constant dense<0.000000e+00> : vector<256x8xf32>
    %55 = tpu.matmul %52, %54, %cst_30 {dimension_numbers = #tpu.dot_dimension_numbers<[1], [0], [0], [1], [0, 0, 1, 1], [], []>} : vector<256x8xf32>, vector<8x8xf32>, vector<256x8xf32> -> vector<256x8xf32>
    %56 = arith.addf %50, %55 : vector<256x8xf32>
    %57 = vector.extract_strided_slice %56 {offsets = [0, 0], sizes = [256, 4], strides = [1, 1]} : vector<256x8xf32> to vector<256x4xf32>
    %c0_31 = arith.constant 0 : index
    %c0_32 = arith.constant 0 : index
    %c0_33 = arith.constant 0 : index
    %58 = vector.load %arg4[%c0_31, %c0_32, %c0_33] : memref<2x1x4xf32, #tpu.memory_space<vmem>>, vector<1x1x4xf32>
    %59 = vector.shape_cast %58 : vector<1x1x4xf32> to vector<1x4xf32>
    %60 = vector.broadcast %59 : vector<1x4xf32> to vector<256x4xf32>
    %61 = arith.addf %57, %60 : vector<256x4xf32>
    %c0_34 = arith.constant 0 : index
    %c0_35 = arith.constant 0 : index
    %c0_36 = arith.constant 0 : index
    %c0_37 = arith.constant 0 : index
    %62 = vector.load %arg5[%c0_34, %c0_35, %c0_36, %c0_37] : memref<2x1x256x4xf32, #tpu.memory_space<vmem>>, vector<1x1x256x4xf32>
    %63 = vector.shape_cast %62 : vector<1x1x256x4xf32> to vector<256x4xf32>
    %64 = vector.shape_cast %61 : vector<256x4xf32> to vector<1x1x256x4xf32>
    tpu.vector_store %arg5[%c0_34, %c0_35, %c0_36, %c0_37], %64 {strides = array<i32>} : memref<2x1x256x4xf32, #tpu.memory_space<vmem>>, vector<1x1x256x4xf32>,
    %65 = vector.extract_strided_slice %56 {offsets = [0, 4], sizes = [256, 4], strides = [1, 1]} : vector<256x8xf32> to vector<256x4xf32>
    %c1_38 = arith.constant 1 : index
    %c0_39 = arith.constant 0 : index
    %c0_40 = arith.constant 0 : index
    %66 = vector.load %arg4[%c1_38, %c0_39, %c0_40] : memref<2x1x4xf32, #tpu.memory_space<vmem>>, vector<1x1x4xf32>
    %67 = vector.shape_cast %66 : vector<1x1x4xf32> to vector<1x4xf32>
    %68 = vector.broadcast %67 : vector<1x4xf32> to vector<256x4xf32>
    %69 = arith.addf %65, %68 : vector<256x4xf32>
    %c1_41 = arith.constant 1 : index
    %c0_42 = arith.constant 0 : index
    %c0_43 = arith.constant 0 : index
    %c0_44 = arith.constant 0 : index
    %70 = vector.load %arg5[%c1_41, %c0_42, %c0_43, %c0_44] : memref<2x1x256x4xf32, #tpu.memory_space<vmem>>, vector<1x1x256x4xf32>
    %71 = vector.shape_cast %70 : vector<1x1x256x4xf32> to vector<256x4xf32>
    %72 = vector.shape_cast %69 : vector<256x4xf32> to vector<1x1x256x4xf32>
    tpu.vector_store %arg5[%c1_41, %c0_42, %c0_43, %c0_44], %72 {strides = array<i32>} : memref<2x1x256x4xf32, #tpu.memory_space<vmem>>, vector<1x1x256x4xf32>,
    return
  }
  func.func @transform_0(%arg0: i32, %arg1: i32) -> (i32, i32, i32, i32) {
    %c0_i32 = arith.constant 0 : i32
    %c0_i32_0 = arith.constant 0 : i32
    %c0_i32_1 = arith.constant 0 : i32
    %c0_i32_2 = arith.constant 0 : i32
    return %arg0, %c0_i32, %c0_i32_0, %c0_i32_1 : i32, i32, i32, i32
  }
  func.func @transform_1(%arg0: i32, %arg1: i32) -> (i32, i32, i32) {
    %c0_i32 = arith.constant 0 : i32
    %c0_i32_0 = arith.constant 0 : i32
    %c0_i32_1 = arith.constant 0 : i32
    %c0_i32_2 = arith.constant 0 : i32
    return %c0_i32, %c0_i32_0, %c0_i32_1 : i32, i32, i32
  }
  func.func @transform_2(%arg0: i32, %arg1: i32) -> (i32, i32, i32) {
    %c0_i32 = arith.constant 0 : i32
    %c0_i32_0 = arith.constant 0 : i32
    %c0_i32_1 = arith.constant 0 : i32
    %c0_i32_2 = arith.constant 0 : i32
    return %c0_i32, %c0_i32_0, %c0_i32_1 : i32, i32, i32
  }
  func.func @transform_3(%arg0: i32, %arg1: i32) -> (i32, i32, i32, i32) {
    %c0_i32 = arith.constant 0 : i32
    %c0_i32_0 = arith.constant 0 : i32
    %c0_i32_1 = arith.constant 0 : i32
    return %c0_i32, %arg0, %arg1, %c0_i32_0 : i32, i32, i32, i32
  }
}

</mosaic_0001>

<bundles_post_ra>
// kernel: tpu_custom_call.1
= control target key start
LH: loop header
LB: loop body
LE: loop exit
PB: predicated region body
PF: predicated region fallthrough
CT: control target
= control target key end

     0   :  { %8 = vsyncpa [#allocation3], 0  ;;  %s6614_s0 = inlined_call_operand.hbm [shape: f32[2,18,18,8], index: 0, kind: input, shape index: {}]   ;;  %s6615_s1 = inlined_call_operand.hbm [shape: f32[9,8,8], index: 1, kind: input, shape index: {}]   ;;  %s6616_s2 = inlined_call_operand.hbm [shape: f32[2,1,4], index: 2, kind: input, shape index: {}]   ;;  %s6617_s3 = inlined_call_operand.hbm [shape: f32[2,2,256,4], index: 3, kind: output, shape index: {}]  }
   0x1   :  { %10 = vsyncpa [#allocation3 + $0x1], 0 }
   0x2   :  { %11 = vsyncpa [#allocation6], 0 }
   0x3   :  { %12 = vsyncpa [#allocation4], 0 }
   0x4   :  { %14 = vsyncpa [#allocation4 + $0x1], 0  ;;  %s5060_s12 = smov 0   ;;  %s5062_s13 = smov 0  }
   0x5   :  { %s5064_s14 = smov 0   ;;  %s5066_s15 = smov 0  }
   0x6   :  { %s5068_s16 = smov 0   ;;  %s5070_s17 = smov 0  }
   0x7 LB: > { %s3429_s18 = sadd.s32 4294967295, %s5022_s17   ;;  %s3430_s19 = sadd.s32 4294967294, %s5022_s17   ;;  %s5022_s17 = sphi %s5070_s17, %s20_s17   ;;  %s5018_s16 = sphi %s5068_s16, %s6813_s16   ;;  %s5014_s15 = sphi %s5066_s15, %s6812_s15   ;;  %s5010_s14 = sphi %s5064_s14, %s6811_s14   ;;  %s5006_s13 = sphi %s5062_s13, %s6810_s13   ;;  %s5002_s12 = sphi %s5060_s12, %s6809_s12  }
   0x8   : > { %p52_p0 = scmp.ne.s32.totalorder %s5006_s13, %s5002_s12  ;;  %p5094_p1 = scmp.eq.s32.totalorder %s3429_s18, 0 }
   0x9   : > { %p5098_p2 = scmp.eq.s32.totalorder %s3429_s18, 1  ;;  %p126_p3 = scmp.eq.s32.totalorder %s3430_s19, 1 }
   0xa   : > { %s6695_s20 = scalar_select %p5094_p1, 1, 0 }
   0xb   : > { %p5104_p4 = por %p5094_p1, %p52_p0  ;;  %p3431_p5 = scmp.ge.s32.totalorder %s5022_s17, 1 }
   0xc   : > { %p5109_p6 = por %p126_p3, %p52_p0  ;;  %p133_p7 = scmp.lt.s32.totalorder %s5022_s17, 3 }
   0xd   : > { %s6697_s22 = scalar_select %p5104_p4, 1, 0 }
   0xe   : > { %s6698_s23 = scalar_select %p5109_p6, 1, 0 }
   0xf   : > { %p5114_p8 = pnand %p3431_p5, %p133_p7  ;;  %s5024_s25 = smov [#allocation5]  }
  0x10   : > { %s145_s26 = sshll.u32 %s5024_s25, 4  ;;  %s5025_s28 = smov [#allocation7]   ;;  %s5118_s26 = int_to_ptr.vmem [resolvable:$true] %s145_s26 }
  0x11   : > { %p4794_p9 = pneg %p5114_p8  ;;  %s158_s29 = sshll.u32 %s5025_s28, 4  ;;  %s5129_s29 = int_to_ptr.vmem [resolvable:$true] %s158_s29 }
  0x12   : > { %s4878_s5 = scalar_lea.hbm %s6615_s1, 1152 }
  0x13   : > { %p5125_p11 = pnand %p4794_p9, %p5094_p1  ;;  %p4879_p12 = scmp.ne.s32.totalorder %s6615_s1, %s4878_s5 }
  0x14   : > { %p4885_p5 = scmp.lt.u32.totalorder %s4878_s5, %s6615_s1 }
  0x15   : > { %p4880_p13 = pneg %p5125_p11 }
  0x17   : > { %p4881_p0 = pnand %p4880_p13, %p4879_p12 }
  0x19   : > { %p4882_p3 = pneg %p4881_p0 }
  0x1b   : > { %p4887_p7 = pnand %p4885_p5, %p4882_p3 }
  0x1d   : > { %4890 = shalt.err (!%p4887_p7)
}
  0x1e   : > { %s4891_s10 = scalar_lea.vmem %s5118_s26, 1152  ;;  %p4899_p1 = scmp.lt.s32.totalorder %s5118_s26, %s5118_s26 }
  0x1f   : > { %p4892_p9 = scmp.ne.s32.totalorder %s5118_s26, %s4891_s10  ;;  %p4900_p12 = scmp.lt.s32.totalorder %s4891_s10, %s4891_s10 }
  0x21   : > { %p4894_p10 = pnand %p4892_p9, %p4880_p13  ;;  %p4901_p0 = por %p4900_p12, %p4899_p1 }
  0x23   : > { %p4895_p6 = pneg %p4894_p10 }
  0x25   : > { %p4902_p4 = pnand %p4901_p0, %p4895_p6 }
  0x27   : > { %4905 = shalt.err (!%p4902_p4)
}
  0x28   : > { %s5026_s11 = smov 128   ;;  %s5027_s18 = smov 8  }
  0x29   : > { %4797 = dma.hbm_to_vmem [thread:$0]  (!%p5125_p11), %s6615_s1, 1152, %s5118_s26, [#allocation6], %s5026_s11, %s5026_s11, %s5027_s18  }
  0x2a   : > { %s4906_s4 = scalar_lea.hbm %s6616_s2, 32 }
  0x2b   : > { %p4907_p1 = scmp.ne.s32.totalorder %s6616_s2, %s4906_s4  ;;  %p4913_p10 = scmp.lt.u32.totalorder %s4906_s4, %s6616_s2 }
  0x2d   : > { %p4909_p4 = pnand %p4907_p1, %p4880_p13 }
  0x2f   : > { %p4910_p6 = pneg %p4909_p4 }
  0x31   : > { %p4915_p3 = pnand %p4913_p10, %p4910_p6 }
  0x33   : > { %4918 = shalt.err (!%p4915_p3)
}
  0x34   : > { %s4919_s26 = scalar_lea.vmem %s5129_s29, 32  ;;  %p4927_p12 = scmp.lt.s32.totalorder %s5129_s29, %s5129_s29 }
  0x35   : > { %p4920_p5 = scmp.ne.s32.totalorder %s5129_s29, %s4919_s26  ;;  %p4928_p0 = scmp.lt.s32.totalorder %s4919_s26, %s4919_s26 }
  0x37   : > { %p4922_p7 = pnand %p4920_p5, %p4880_p13  ;;  %p4929_p1 = por %p4928_p0, %p4927_p12 }
  0x39   : > { %p4923_p9 = pneg %p4922_p7 }
  0x3b   : > { %p4930_p4 = pnand %p4929_p1, %p4923_p9 }
  0x3d   : > { %4933 = shalt.err (!%p4930_p4)
}
  0x3e   : > { %s5028_s9 = smov 16   ;;  %s5029_s10 = smov 1  }
  0x3f   : > { %4800 = dma.hbm_to_vmem [thread:$0]  (!%p5125_p11), %s6616_s2, 32, %s5129_s29, [#allocation6], %s5028_s9, %s5028_s9, %s5029_s10  }
  0x40   : > { %s32_s28 = sadd.s32 1, %s5018_s16  ;;  %s39_s30 = sadd.s32 1, %s5010_s14 }
  0x41   : > { %p34_p13 = scmp.ge.s32.totalorder %s32_s28, 2  ;;  %p46_p6 = scmp.ne.s32.totalorder %s5010_s14, %s5006_s13 }
  0x42   : > { %p47_p10 = scmp.eq.s32.totalorder %s5022_s17, 0  ;;  %p4811_p3 = scmp.lt.s32.totalorder %s5022_s17, 2 }
  0x43   : > { %s6815_s28 = smov (%p34_p13, %s32_s28), 0  ;;  %p5196_p7 = por %p5098_p2, %p46_p6 }
  0x44   : > { %p48_p5 = por %p47_p10, %p46_p6  ;;  %s36_s27 = ssub.s32 %s5018_s16, %s6815_s28 }
  0x45   : > { %s6701_s4 = scalar_select %p5196_p7, 1, 0 }
  0x46   : > { %s172_s5 = sand.u32 1, %s5010_s14   ;;  %p37_p9 = scmp.eq.s32.totalorder %s36_s27, 0 }
  0x47   : > { %s4773_s29 = smul.u32 432, %s172_s5  ;;  %p5203_p11 = pnand %p4811_p3, %p48_p5 }
  0x48   : > { %s5208_s7 = scalar_select %p37_p9, %s5010_s14, %s39_s30  }
  0x49   : > { %s4774_s8 = smul.u32 6912, %s5018_s16  ;;  %s176_s26 = scalar_lea.vmem [#allocation2], %s4773_s29 }
  0x4a   : > { %s183_s9 = sshll.u32 %s176_s26, 4  ;;  %s5218_s25 = scalar_lea.sflag [#allocation3], %s172_s5  ;;  %s5216_s9 = int_to_ptr.vmem [resolvable:$true] %s183_s9 }
  0x4b   : > { %s5214_s19 = scalar_lea.hbm %s6614_s0, %s4774_s8  ;;  %p4936_p12 = pneg %p5203_p11 }
  0x4c   : > { %s4934_s27 = scalar_lea.hbm %s5214_s19, 6912  ;;  %s4939_s8 = scalar_lea.hbm %s6614_s0, 13824 }
  0x4d   : > { %p4935_p2 = scmp.ne.s32.totalorder %s5214_s19, %s4934_s27  ;;  %p4940_p4 = scmp.lt.u32.totalorder %s5214_s19, %s6614_s0 }
  0x4e   : > { %p4941_p13 = scmp.lt.u32.totalorder %s4939_s8, %s4934_s27  ;;  %p4943_p10 = scmp.lt.u32.totalorder %s4934_s27, %s5214_s19 }
  0x4f   : > { %p4937_p0 = pnand %p4936_p12, %p4935_p2 }
  0x50   : > { %p4942_p6 = por %p4941_p13, %p4940_p4 }
  0x51   : > { %p4938_p1 = pneg %p4937_p0 }
  0x52   : > { %p4944_p3 = por %p4943_p10, %p4942_p6 }
  0x54   : > { %p4945_p5 = pnand %p4944_p3, %p4938_p1 }
  0x56   : > { %4948 = shalt.err (!%p4945_p5)
}
  0x57   : > { %s4949_s5 = scalar_lea.vmem %s5216_s9, 6912  ;;  %s5030_s10 = smov [#allocation2]  }
  0x58   : > { %p4950_p9 = scmp.ne.s32.totalorder %s5216_s9, %s4949_s5  ;;  %s4954_s30 = sshll.u32 %s5030_s10, 4  ;;  %s4955_s30 = int_to_ptr.vmem [resolvable:$false] %s4954_s30 }
  0x59   : > { %s4956_s29 = scalar_lea.vmem %s4955_s30, 13824  ;;  %p4957_p7 = scmp.lt.s32.totalorder %s5216_s9, %s4955_s30 }
  0x5a   : > { %p4952_p2 = pnand %p4950_p9, %p4936_p12  ;;  %p4958_p4 = scmp.lt.s32.totalorder %s4956_s29, %s4949_s5 }
  0x5c   : > { %p4953_p0 = pneg %p4952_p2  ;;  %p4959_p13 = por %p4958_p4, %p4957_p7 }
  0x5e   : > { %p4960_p6 = pnand %p4959_p13, %p4953_p0 }
  0x60   : > { %4963 = shalt.err (!%p4960_p6)
}
  0x61   : > { %4804 = dma.hbm_to_vmem [thread:$0]  (!%p5203_p11), %s5214_s19, 6912, %s5216_s9, %s5218_s25, %s5026_s11, %s5026_s11, %s5027_s18  }
  0x62   : > { %195 = sbr.rel (%p5114_p8) target bundleno = 749 (0x2ed), region = 32 }
  0x69   : > { %s5252_s27 = sand.u32 1, %s5006_s13   ;;  %p6703_p7 = scmp.ne.s32.totalorder %s6697_s22, 0 }
  0x6a   : > { %s4775_s8 = smul.u32 432, %s5252_s27  ;;  %s198_s26 = scalar_lea.sflag [#allocation3], %s5252_s27 }
  0x6c   : > { %s5256_s21 = scalar_lea.vmem [#allocation2], %s4775_s8 }
  0x6d   : > { %4989 = dma.done.wait (%p6703_p7), %s198_s26, 6912  }
  0x6e   : > { %4991 = vsyncadd (%p6703_p7), %s198_s26, 4294960384  ;;  %p6704_p11 = scmp.ne.s32.totalorder %s6695_s20, 0 }
  0x70   : > { %4993 = dma.done.wait (%p6704_p11), [#allocation6], 1184  }
  0x71   : > { %4995 = vsyncadd (%p6704_p11), [#allocation6], 4294966112  ;;  %v418_v0 = vld [vmem:[#allocation5 + $0x8] sm:$0xff]  ;;  %v5266_v1 = vld [vmem:[#allocation5 + $0x20] sm:$0xff]  ;;  %vm336_vm0 = vcmask 1046528   ;;  %vm419_vm1 = vcmask 64512  }
  0x72   : > { %v5269_v2 = vld [vmem:[%s5256_s21] sm:$0xff]  ;;  %4065 = vmatprep.subr.mxu1 %v418_v0  ;;  %4265 = vmatprep.subr.mxu0 %v5266_v1  ;;  %v5273_v3 = vld [vmem:[%s5256_s21 + $0x8] sm:$0xff]  ;;  %v5277_v6 = vld [vmem:[%s5256_s21 + $0x18] sm:$0xff]  ;;  %vm998_vm2 = vcmask 1045504   ;;  %s5031_s20 = smov 4   ;;  %s3439_s22 = sshll.u32 %s5252_s27, 9 }
  0x73   : > { %v337_v4 = vrot.slane %v5269_v2, 1  ;;  %v287_v5 = vld [vmem:[#allocation5] sm:$0xff]  ;;  %6705 = vst [vmem:[#allocation14_spill] sm:$0xff] %v5277_v6  ;;  %4066 = vmatpush3.msra.mxu1 %v418_v0  ;;  %4266 = vmatpush3.msra.mxu0 %v5266_v1  ;;  %v338_v7 = vrot.slane %v5273_v3, 1  ;;  %v342_v9 = vrot.slane %v5277_v6, 1  ;;  %v1942_v10 = vld [vmem:[#allocation5 + $0x28] sm:$0xff] }
  0x74   : > { %v5282_v8 = vld [vmem:[%s5256_s21 + $0x20] sm:$0xff]  ;;  %v5286_v11 = vld [vmem:[%s5256_s21 + $0x10] sm:$0x3]  ;;  %4115 = vmatprep.subr.mxu1 %v287_v5  ;;  %4315 = vmatprep.subr.mxu0 %v1942_v10  ;;  %v5291_v14 = vld [vmem:[%s5256_s21 + $0x28] sm:$0x3]  ;;  %vm3045_vm3 = vcmask 31744  }
  0x75   : > { %6706 = vst [vmem:[#allocation15_spill] sm:$0xff] %v5282_v8  ;;  %v343_v12 = vrot.slane %v5282_v8, 1  ;;  %v340_v13 = vrot.slane %v5286_v11, 1  ;;  %v5294_v15 = vld [vmem:[%s5256_s21 + $0x30] sm:$0xff]  ;;  %v339_v16 = vsel %vm336_vm0, %v337_v4, %v338_v7  ;;  %v345_v17 = vrot.slane %v5291_v14, 1  ;;  %v5299_v18 = vld [vmem:[%s5256_s21 + $0x38] sm:$0xff] }
  0x76   : > { %v347_v19 = vrot.slane %v5294_v15, 1  ;;  %v5303_v20 = vld [vmem:[%s5256_s21 + $0x40] sm:$0x3]  ;;  %4067 = vmatprep.mubr.msk.f32.mxu1 %vm419_vm1, %v339_v16  ;;  %v348_v23 = vrot.slane %v5299_v18, 1  ;;  %v5311_v25 = vld [vmem:[%s5256_s21 + $0x48] sm:$0xff]  ;;  %v5314_v26 = vld [vmem:[%s5256_s21 + $0x50] sm:$0xff] }
  0x77   : > { %v344_v21 = vsel %vm336_vm0, %v342_v9, %v343_v12  ;;  %v341_v22 = vsel %vm336_vm0, %v338_v7, %v340_v13  ;;  %v350_v24 = vrot.slane %v5303_v20, 1  ;;  %v5317_v27 = vld [vmem:[%s5256_s21 + $0x58] sm:$0x3]  ;;  %v346_v28 = vsel %vm336_vm0, %v343_v12, %v345_v17  ;;  %v5325_v31 = vld [vmem:[%s5256_s21 + $0x60] sm:$0xff]  ;;  %v5328_v32 = vld [vmem:[%s5256_s21 + $0x68] sm:$0xff]  ;;  %s6343_s24 = scalar_lea.vmem [#allocation8], %s3439_s22 }
  0x78   : > { %4267 = vmatprep.mubr.msk.f32.mxu0 %vm419_vm1, %v344_v21  ;;  %4068 = vmatmul.mubr.msk.f32.vlgmr.msra.gmra.mrb[0].mxu1 %vm419_vm1, %v341_v22  ;;  %v352_v29 = vrot.slane %v5311_v25, 1  ;;  %v353_v30 = vrot.slane %v5314_v26, 1  ;;  %v5332_v33 = vsel %vm336_vm0, %v347_v19, %v348_v23  ;;  %v355_v35 = vrot.slane %v5317_v27, 1  ;;  %v5347_v39 = vld [vmem:[%s5256_s21 + $0x70] sm:$0x3]  ;;  %v5351_v40 = vld [vmem:[%s5256_s21 + $0x78] sm:$0xff] }
  0x79   : > { %4116 = vmatpush3.msra.mxu1 %v287_v5  ;;  %4268 = vmatmul.mubr.msk.f32.vlgmr.msra.gmra.mrb[0].mxu0 %vm419_vm1, %v346_v28  ;;  %6707 = vst [vmem:[#allocation16_spill] sm:$0xff] %v5332_v33  ;;  %v5336_v34 = vsel %vm336_vm0, %v348_v23, %v350_v24  ;;  %v357_v37 = vrot.slane %v5325_v31, 1  ;;  %v358_v38 = vrot.slane %v5328_v32, 1  ;;  %v5354_v41 = vld [vmem:[%s5256_s21 + $0x80] sm:$0xff]  ;;  %v360_v44 = vrot.slane %v5347_v39, 1  ;;  %v5380_v49 = vld [vmem:[%s5256_s21 + $0x90] sm:$0xff] }
  0x7a   : > { %4316 = vmatpush3.msra.mxu0 %v1942_v10  ;;  %4070 = vmatprep.mubr.msk.f32.mxu1 %vm419_vm1, %v344_v21  ;;  %6708 = vst [vmem:[#allocation17_spill] sm:$0xff] %v5336_v34  ;;  %v5342_v36 = vsel %vm336_vm0, %v352_v29, %v353_v30  ;;  %v5360_v42 = vld [vmem:[#allocation5 + $0x30] sm:$0xff]  ;;  %v5365_v43 = vsel %vm336_vm0, %v353_v30, %v355_v35  ;;  %v362_v46 = vrot.slane %v5351_v40, 1  ;;  %v363_v47 = vrot.slane %v5354_v41, 1  ;;  %v5375_v48 = vld [vmem:[%s5256_s21 + $0x88] sm:$0x3] }
  0x7b   : > { %4270 = vmatprep.mubr.msk.f32.mxu0 %vm419_vm1, %v5332_v33  ;;  %6709 = vst [vmem:[#allocation18_spill] sm:$0xff] %v5342_v36  ;;  %6710 = vst [vmem:[#allocation19_spill] sm:$0xff] %v5365_v43  ;;  %4365 = vmatprep.subr.mxu0 %v5360_v42  ;;  %v5370_v45 = vsel %vm336_vm0, %v357_v37, %v358_v38  ;;  %v5383_v50 = vld [vmem:[%s5256_s21 + $0x98] sm:$0xff]  ;;  %v5392_v51 = vsel %vm336_vm0, %v358_v38, %v360_v44  ;;  %v365_v52 = vrot.slane %v5375_v48, 1  ;;  %v5401_v56 = vld [vmem:[%s5256_s21 + $0xa0] sm:$0x3] }
  0x7c   : > { %4071 = vmatmul.mubr.msk.f32.gmra.mrb[2].mxu1 %vm419_vm1, %v346_v28  ;;  %6711 = vst [vmem:[#allocation20_spill] sm:$0xff] %v5370_v45  ;;  %6712 = vst [vmem:[#allocation21_spill] sm:$0xff] %v5392_v51  ;;  %v5396_v53 = vsel %vm336_vm0, %v362_v46, %v363_v47  ;;  %v367_v54 = vrot.slane %v5380_v49, 1  ;;  %v368_v55 = vrot.slane %v5383_v50, 1  ;;  %v5406_v57 = vld [vmem:[%s5256_s21 + $0xa8] sm:$0xff]  ;;  %v5409_v58 = vld [vmem:[%s5256_s21 + $0xb0] sm:$0xff] }
  0x7d   : > { %4271 = vmatmul.mubr.msk.f32.gmra.mrb[2].mxu0 %vm419_vm1, %v5336_v34  ;;  %4073 = vmatprep.mubr.msk.f32.mxu1 %vm419_vm1, %v5332_v33  ;;  %6713 = vst [vmem:[#allocation22_spill] sm:$0xff] %v5396_v53  ;;  %v5418_v59 = vsel %vm336_vm0, %v363_v47, %v365_v52  ;;  %v370_v60 = vrot.slane %v5401_v56, 1  ;;  %v5421_v61 = vld [vmem:[#allocation5 + $0x10] sm:$0xff]  ;;  %v372_v63 = vrot.slane %v5406_v57, 1  ;;  %v373_v0 = vrot.slane %v5409_v58, 1  ;;  %v5438_v7 = vld [vmem:[%s5256_s21 + $0xc8] sm:$0xff] }
  0x7e   : > { %4273 = vmatprep.mubr.msk.f32.mxu0 %vm419_vm1, %v5342_v36  ;;  %6714 = vst [vmem:[#allocation23_spill] sm:$0xff] %v5418_v59  ;;  %v5424_v62 = vsel %vm336_vm0, %v367_v54, %v368_v55  ;;  %v5429_v4 = vld [vmem:[%s5256_s21 + $0xb8] sm:$0x3]  ;;  %4165 = vmatprep.subr.mxu1 %v5421_v61  ;;  %v5435_v5 = vld [vmem:[%s5256_s21 + $0xc0] sm:$0xff]  ;;  %v378_v16 = vrot.slane %v5438_v7, 1  ;;  %v1004_v23 = vrot.slane %v5277_v6, 2 }
  0x7f   : > { %6715 = vst [vmem:[#allocation24_spill] sm:$0xff] %v5424_v62  ;;  %v5447_v9 = vsel %vm336_vm0, %v368_v55, %v370_v60  ;;  %v375_v10 = vrot.slane %v5429_v4, 1  ;;  %v5451_v12 = vsel %vm336_vm0, %v372_v63, %v373_v0  ;;  %v377_v13 = vrot.slane %v5435_v5, 1  ;;  %v5456_v17 = vld [vmem:[%s5256_s21 + $0xd0] sm:$0x3]  ;;  %v5476_v28 = vld [vmem:[%s5256_s21 + $0xd8] sm:$0xff] }
  0x80   : > { %4074 = vmatmul.mubr.msk.f32.gmra.mrb[4].mxu1 %vm419_vm1, %v5336_v34  ;;  %6716 = vst [vmem:[#allocation25_spill] sm:$0xff] %v5447_v9  ;;  %6717 = vst [vmem:[#allocation26_spill] sm:$0xff] %v5451_v12  ;;  %v380_v21 = vrot.slane %v5456_v17, 1  ;;  %v1005_v24 = vrot.slane %v5282_v8, 2  ;;  %v5479_v29 = vld [vmem:[%s5256_s21 + $0xe0] sm:$0xff]  ;;  %v1007_v30 = vrot.slane %v5291_v14, 2 }
  0x81   : > { %4274 = vmatmul.mubr.msk.f32.gmra.mrb[4].mxu0 %vm419_vm1, %v5365_v43  ;;  %4076 = vmatprep.mubr.msk.f32.mxu1 %vm419_vm1, %v5342_v36  ;;  %v5467_v19 = vsel %vm336_vm0, %v373_v0, %v375_v10  ;;  %v5471_v22 = vsel %vm336_vm0, %v377_v13, %v378_v16  ;;  %v382_v37 = vrot.slane %v5476_v28, 1  ;;  %v383_v38 = vrot.slane %v5479_v29, 1  ;;  %v5496_v44 = vld [vmem:[%s5256_s21 + $0xe8] sm:$0x3]  ;;  %v5504_v52 = vld [vmem:[%s5256_s21 + $0xf0] sm:$0xff]  ;;  %v5507_v54 = vld [vmem:[%s5256_s21 + $0xf8] sm:$0xff] }
  0x82   : > { %4276 = vmatprep.mubr.msk.f32.mxu0 %vm419_vm1, %v5370_v45  ;;  %6718 = vst [vmem:[#allocation27_spill] sm:$0xff] %v5467_v19  ;;  %6719 = vst [vmem:[#allocation28_spill] sm:$0xff] %v5471_v22  ;;  %v5491_v35 = vsel %vm336_vm0, %v378_v16, %v380_v21  ;;  %v5499_v46 = vsel %vm998_vm2, %v1004_v23, %v1005_v24  ;;  %v1009_v47 = vrot.slane %v5294_v15, 2  ;;  %v1010_v14 = vrot.slane %v5299_v18, 2  ;;  %v5528_v16 = vld [vmem:[%s5256_s21 + $0x100] sm:$0x3] }
  0x83   : > { %6720 = vst [vmem:[#allocation29_spill] sm:$0xff] %v5491_v35  ;;  %v385_v55 = vrot.slane %v5496_v44, 1  ;;  %v1012_v60 = vrot.slane %v5303_v20, 2  ;;  %v5520_v63 = vsel %vm998_vm2, %v1005_v24, %v1007_v30  ;;  %v5523_v0 = vsel %vm336_vm0, %v382_v37, %v383_v38  ;;  %v5539_v24 = vld [vmem:[%s5256_s21 + $0x110] sm:$0xff]  ;;  %v5543_v30 = vld [vmem:[#allocation5 + $0x38] sm:$0xff]  ;;  %s5032_s11 = smov 124  }
  0x84   : > { %4077 = vmatmul.mubr.msk.f32.gmra.mrb[6].mxu1 %vm419_vm1, %v5365_v43  ;;  %6721 = vst [vmem:[#allocation30_spill] sm:$0xff] %v5523_v0  ;;  %v387_v10 = vrot.slane %v5504_v52, 1  ;;  %v388_v13 = vrot.slane %v5507_v54, 1  ;;  %v5531_v21 = vsel %vm998_vm2, %v1009_v47, %v1010_v14  ;;  %v1014_v20 = vrot.slane %v5311_v25, 2  ;;  %v5637_v34 = vld [vmem:[%s5256_s21 + $0x148] sm:$0x3] }
  0x85   : > { %4277 = vmatmul.mubr.msk.f32.gmra.mrb[6].mxu0 %vm419_vm1, %v5392_v51  ;;  %4079 = vmatprep.mubr.msk.f32.mxu1 %vm419_vm1, %v5370_v45  ;;  %v1015_v23 = vrot.slane %v5314_v26, 2  ;;  %v5550_v37 = vsel %vm336_vm0, %v383_v38, %v385_v55  ;;  %v5553_v47 = vsel %vm998_vm2, %v1010_v14, %v1012_v60  ;;  %v393_v38 = vrot.slane %v5539_v24, 1  ;;  %v5566_v55 = vld [vmem:[%s5256_s21 + $0x118] sm:$0x3]  ;;  %s3282_s18 = scalar_lea.sflag [#allocation4], %s5252_s27 }
  0x86   : > { %4279 = vmatprep.mubr.msk.f32.mxu0 %vm419_vm1, %v5396_v53  ;;  %6722 = vst [vmem:[#allocation31_spill] sm:$0xff] %v5550_v37  ;;  %6723 = vst [vmem:[#allocation32_spill] sm:$0xff] %v5553_v47  ;;  %v1019_v60 = vrot.slane %v5325_v31, 2  ;;  %v5610_v45 = vld [vmem:[%s5256_s21 + $0x138] sm:$0xff]  ;;  %v1027_v43 = vrot.slane %v5375_v48, 2  ;;  %v1032_v33 = vrot.slane %v5401_v56, 2 }
  0x87   : > { %v5569_v14 = vsel %vm998_vm2, %v1014_v20, %v1015_v23  ;;  %v395_v20 = vrot.slane %v5566_v55, 1  ;;  %v402_v36 = vrot.slane %v5610_v45, 1  ;;  %v1034_v56 = vrot.slane %v5406_v57, 2 }
  0x88   : > { %4080 = vmatmul.mubr.msk.f32.gmra.mrb[8].mxu1 %vm419_vm1, %v5392_v51  ;;  %6725 = vst [vmem:[#allocation34_spill] sm:$0xff] %v5569_v14  ;;  %v5602_v51 = vld [vmem:[%s5256_s21 + $0x130] sm:$0x3] }
  0x89   : > { %4280 = vmatmul.mubr.msk.f32.gmra.mrb[8].mxu0 %vm419_vm1, %v5418_v59  ;;  %4082 = vmatprep.mubr.msk.f32.mxu1 %vm419_vm1, %v5396_v53 }
  0x8a   : > { %4282 = vmatprep.mubr.msk.f32.mxu0 %vm419_vm1, %v5424_v62 }
  0x8c   : > { %4083 = vmatmul.mubr.msk.f32.gmra.mrb[10].mxu1 %vm419_vm1, %v5418_v59 }
  0x8d   : > { %4283 = vmatmul.mubr.msk.f32.gmra.mrb[10].mxu0 %vm419_vm1, %v5447_v9  ;;  %4085 = vmatprep.mubr.msk.f32.mxu1 %vm419_vm1, %v5424_v62  ;;  %v1022_v62 = vrot.slane %v5347_v39, 2  ;;  %v1024_v39 = vrot.slane %v5351_v40, 2 }
  0x8e   : > { %4285 = vmatprep.mubr.msk.f32.mxu0 %vm419_vm1, %v5451_v12 }
  0x90   : > { %4086 = vmatmul.mubr.msk.f32.gmra.mrb[12].mxu1 %vm419_vm1, %v5447_v9  ;;  %v5574_v9 = vld [vmem:[%s5256_s21 + $0x120] sm:$0xff] }
  0x91   : > { %4286 = vmatmul.mubr.msk.f32.gmra.mrb[12].mxu0 %vm419_vm1, %v5467_v19  ;;  %4088 = vmatprep.mubr.msk.f32.mxu1 %vm419_vm1, %v5451_v12  ;;  %v1017_v12 = vrot.slane %v5317_v27, 2  ;;  %v397_v53 = vrot.slane %v5574_v9, 1 }
  0x92   : > { %4288 = vmatprep.mubr.msk.f32.mxu0 %vm419_vm1, %v5471_v22 }
  0x93   : > { %v5594_v59 = vsel %vm998_vm2, %v1015_v23, %v1017_v12  ;;  %v5613_v12 = vld [vmem:[%s5256_s21 + $0x140] sm:$0xff] }
  0x94   : > { %4089 = vmatmul.mubr.msk.f32.gmra.mrb[14].mxu1 %vm419_vm1, %v5467_v19  ;;  %v390_v19 = vrot.slane %v5528_v16, 1  ;;  %6727 = vst [vmem:[#allocation36_spill] sm:$0xff] %v5594_v59 }
  0x95   : > { %4289 = vmatmul.mubr.msk.f32.gmra.mrb[14].mxu0 %vm419_vm1, %v5491_v35  ;;  %4091 = vmatprep.mubr.msk.f32.mxu1 %vm419_vm1, %v5471_v22  ;;  %v5536_v22 = vld [vmem:[%s5256_s21 + $0x108] sm:$0xff] }
  0x96   : > { %4317 = vmatprep.mubr.msk.f32.mxu0 %vm419_vm1, %v5499_v46  ;;  %v5587_v27 = vsel %vm336_vm0, %v388_v13, %v390_v19 }
  0x97   : > { %6726 = vst [vmem:[#allocation35_spill] sm:$0xff] %v5587_v27 }
  0x98   : > { %4092 = vmatmul.mubr.msk.f32.gmra.mrb[16].mxu1 %vm419_vm1, %v5491_v35  ;;  %v5560_v35 = vsel %vm336_vm0, %v387_v10, %v388_v13  ;;  %v5577_v10 = vld [vmem:[%s5256_s21 + $0x128] sm:$0xff]  ;;  %v1025_v13 = vrot.slane %v5354_v41, 2 }
  0x99   : > { %4318 = vmatmul.mubr.msk.f32.vlgmr.msra.gmra.mrb[0].mxu0 %vm419_vm1, %v5520_v63  ;;  %4094 = vmatprep.mubr.msk.f32.mxu1 %vm419_vm1, %v5523_v0  ;;  %6724 = vst [vmem:[#allocation33_spill] sm:$0xff] %v5560_v35  ;;  %v392_v0 = vrot.slane %v5536_v22, 1 }
  0x9a   : > { %4366 = vmatpush3.msra.mxu0 %v5360_v42  ;;  %4320 = vmatprep.mubr.msk.f32.mxu0 %vm419_vm1, %v5531_v21  ;;  %v1020_v42 = vrot.slane %v5328_v32, 2 }
  0x9b   : > { %4415 = vmatprep.subr.mxu0 %v5543_v30 }
  0x9c   : > { %4095 = vmatmul.mubr.msk.f32.gmra.mrb[18].mxu1 %vm419_vm1, %v5550_v37  ;;  %v5597_v37 = vsel %vm336_vm0, %v392_v0, %v393_v38  ;;  %v5605_v19 = vsel %vm998_vm2, %v1019_v60, %v1020_v42  ;;  %v5622_v0 = vsel %vm336_vm0, %v393_v38, %v395_v20  ;;  %v5625_v23 = vsel %vm998_vm2, %v1020_v42, %v1022_v62  ;;  %v5645_v20 = vld [vmem:[%s5256_s21 + $0x150] sm:$0xff] }
  0x9d   : > { %4321 = vmatmul.mubr.msk.f32.gmra.mrb[2].mxu0 %vm419_vm1, %v5553_v47  ;;  %4097 = vmatprep.mubr.msk.f32.mxu1 %vm419_vm1, %v5560_v35  ;;  %6728 = vst [vmem:[#allocation37_spill] sm:$0xff] %v5597_v37  ;;  %v398_v35 = vrot.slane %v5577_v10, 1  ;;  %6729 = vst [vmem:[#allocation38_spill] sm:$0xff] %v5605_v19  ;;  %v400_v60 = vrot.slane %v5602_v51, 1  ;;  %v5640_v38 = vsel %vm998_vm2, %v1024_v39, %v1025_v13  ;;  %v1029_v62 = vrot.slane %v5380_v49, 2 }
  0x9e   : > { %4323 = vmatprep.mubr.msk.f32.mxu0 %vm419_vm1, %v5569_v14  ;;  %6730 = vst [vmem:[#allocation39_spill] sm:$0xff] %v5622_v0  ;;  %6731 = vst [vmem:[#allocation40_spill] sm:$0xff] %v5625_v23  ;;  %v1030_v42 = vrot.slane %v5383_v50, 2  ;;  %v405_v39 = vrot.slane %v5637_v34, 1  ;;  %v5707_v47 = vld [vmem:[%s5256_s21 + $0x178] sm:$0x3] }
  0x9f   : > { %6733 = vst [vmem:[#allocation42_spill] sm:$0xff] %v5640_v38  ;;  %v5657_v48 = vsel %vm336_vm0, %v398_v35, %v400_v60  ;;  %v1035_v60 = vrot.slane %v5409_v58, 2 }
  0xa0   : > { %4098 = vmatmul.mubr.msk.f32.gmra.mrb[20].mxu1 %vm419_vm1, %v5587_v27  ;;  %v5631_v27 = vsel %vm336_vm0, %v397_v53, %v398_v35  ;;  %v5648_v53 = vld [vmem:[%s5256_s21 + $0x158] sm:$0xff]  ;;  %6734 = vst [vmem:[#allocation43_spill] sm:$0xff] %v5657_v48  ;;  %v5675_v35 = vsel %vm998_vm2, %v1029_v62, %v1030_v42 }
  0xa1   : > { %4324 = vmatmul.mubr.msk.f32.gmra.mrb[4].mxu0 %vm419_vm1, %v5594_v59  ;;  %4100 = vmatprep.mubr.msk.f32.mxu1 %vm419_vm1, %v5597_v37  ;;  %6732 = vst [vmem:[#allocation41_spill] sm:$0xff] %v5631_v27  ;;  %v403_v37 = vrot.slane %v5613_v12, 1  ;;  %v5672_v59 = vld [vmem:[%s5256_s21 + $0x160] sm:$0x3] }
  0xa2   : > { %4326 = vmatprep.mubr.msk.f32.mxu0 %vm419_vm1, %v5605_v19  ;;  %v5664_v19 = vsel %vm998_vm2, %v1025_v13, %v1027_v43  ;;  %v5683_v43 = vld [vmem:[%s5256_s21 + $0x170] sm:$0xff]  ;;  %v5695_v13 = vsel %vm998_vm2, %v1030_v42, %v1032_v33  ;;  %v410_v62 = vrot.slane %v5672_v59, 1  ;;  %v1039_v33 = vrot.slane %v5435_v5, 2 }
  0xa3   : > { %6735 = vst [vmem:[#allocation44_spill] sm:$0xff] %v5664_v19  ;;  %6737 = vst [vmem:[#allocation46_spill] sm:$0xff] %v5683_v43  ;;  %v1040_v42 = vrot.slane %v5438_v7, 2 }
  0xa4   : > { %4101 = vmatmul.mubr.msk.f32.gmra.mrb[22].mxu1 %vm419_vm1, %v5622_v0  ;;  %v5667_v0 = vsel %vm336_vm0, %v402_v36, %v403_v37  ;;  %v5692_v36 = vsel %vm336_vm0, %v403_v37, %v405_v39  ;;  %6739 = vst [vmem:[#allocation48_spill] sm:$0xff] %v5695_v13  ;;  %v5710_v37 = vsel %vm998_vm2, %v1034_v56, %v1035_v60 }
  0xa5   : > { %4327 = vmatmul.mubr.msk.f32.gmra.mrb[6].mxu0 %vm419_vm1, %v5625_v23  ;;  %4103 = vmatprep.mubr.msk.f32.mxu1 %vm419_vm1, %v5631_v27  ;;  %6736 = vst [vmem:[#allocation45_spill] sm:$0xff] %v5667_v0  ;;  %v407_v23 = vrot.slane %v5645_v20, 1  ;;  %v408_v27 = vrot.slane %v5648_v53, 1  ;;  %6738 = vst [vmem:[#allocation47_spill] sm:$0xff] %v5692_v36 }
  0xa6   : > { %4329 = vmatprep.mubr.msk.f32.mxu0 %vm419_vm1, %v5640_v38  ;;  %v5680_v38 = vld [vmem:[%s5256_s21 + $0x168] sm:$0xff] }
  0xa7   : > { %v5701_v14 = vsel %vm336_vm0, %v407_v23, %v408_v27  ;;  %v415_v23 = vrot.slane %v5707_v47, 1 }
  0xa8   : > { %4104 = vmatmul.mubr.msk.f32.gmra.mrb[24].mxu1 %vm419_vm1, %v5657_v48  ;;  %6740 = vst [vmem:[#allocation49_spill] sm:$0xff] %v5701_v14  ;;  %v1037_v48 = vrot.slane %v5429_v4, 2  ;;  %v5721_v4 = vsel %vm336_vm0, %v408_v27, %v410_v62  ;;  %v1045_v27 = vrot.slane %v5479_v29, 2  ;;  %v1049_v62 = vrot.slane %v5504_v52, 2 }
  0xa9   : > { %4330 = vmatmul.mubr.msk.f32.gmra.mrb[8].mxu0 %vm419_vm1, %v5664_v19  ;;  %4106 = vmatprep.mubr.msk.f32.mxu1 %vm419_vm1, %v5667_v0  ;;  %v412_v19 = vrot.slane %v5680_v38, 1  ;;  %v413_v0 = vrot.slane %v5683_v43, 1  ;;  %6741 = vst [vmem:[#allocation50_spill] sm:$0xff] %v5721_v4 }
  0xaa   : > { %4332 = vmatprep.mubr.msk.f32.mxu0 %vm419_vm1, %v5675_v35  ;;  %v5727_v39 = vsel %vm998_vm2, %v1035_v60, %v1037_v48  ;;  %v1047_v48 = vrot.slane %v5496_v44, 2 }
  0xab   : > { %v5730_v56 = vsel %vm336_vm0, %v412_v19, %v413_v0  ;;  %v5745_v19 = vsel %vm336_vm0, %v413_v0, %v415_v23  ;;  %v5777_v23 = vld [vmem:[#allocation5 + $0x18] sm:$0xff] }
  0xac   : > { %4107 = vmatmul.mubr.msk.f32.gmra.mrb[26].mxu1 %vm419_vm1, %v5692_v36  ;;  %6742 = vst [vmem:[#allocation51_spill] sm:$0xff] %v5730_v56  ;;  %v1042_v36 = vrot.slane %v5456_v17, 2  ;;  %6743 = vst [vmem:[#allocation52_spill] sm:$0xff] %v5745_v19  ;;  %v5767_v44 = vsel %vm998_vm2, %v1045_v27, %v1047_v48 }
  0xad   : > { %4333 = vmatmul.mubr.msk.f32.gmra.mrb[10].mxu0 %vm419_vm1, %v5695_v13  ;;  %4109 = vmatprep.mubr.msk.f32.mxu1 %vm419_vm1, %v5701_v14  ;;  %v5734_v13 = vsel %vm998_vm2, %v1039_v33, %v1040_v42  ;;  %v1044_v14 = vrot.slane %v5476_v28, 2  ;;  %v1050_v33 = vrot.slane %v5507_v54, 2 }
  0xae   : > { %4335 = vmatprep.mubr.msk.f32.mxu0 %vm419_vm1, %v5710_v37  ;;  %v5750_v17 = vsel %vm998_vm2, %v1040_v42, %v1042_v36  ;;  %v1054_v36 = vrot.slane %v5536_v22, 2  ;;  %v1055_v42 = vrot.slane %v5539_v24, 2 }
  0xaf   : > { %v5754_v60 = vsel %vm998_vm2, %v1044_v14, %v1045_v27  ;;  %v1052_v14 = vrot.slane %v5528_v16, 2  ;;  %v5771_v0 = vsel %vm998_vm2, %v1049_v62, %v1050_v33  ;;  %v1057_v27 = vrot.slane %v5566_v55, 2 }
  0xb0   : > { %4110 = vmatmul.mubr.msk.f32.gmra.mrb[28].mxu1 %vm419_vm1, %v5721_v4  ;;  %v5791_v48 = vsel %vm998_vm2, %v1054_v36, %v1055_v42  ;;  %v1059_v62 = vrot.slane %v5574_v9, 2  ;;  %v1064_v36 = vrot.slane %v5610_v45, 2  ;;  %v1075_v4 = vrot.slane %v5683_v43, 2 }
  0xb1   : > { %4336 = vmatmul.mubr.msk.f32.gmra.mrb[12].mxu0 %vm419_vm1, %v5727_v39  ;;  %4112 = vmatprep.mubr.msk.f32.mxu1 %vm419_vm1, %v5730_v56  ;;  %v5787_v16 = vsel %vm998_vm2, %v1050_v33, %v1052_v14  ;;  %6744 = vst [vmem:[#allocation53_spill] sm:$0xff] %v5791_v48  ;;  %v5805_v55 = vsel %vm998_vm2, %v1055_v42, %v1057_v27  ;;  %v1062_v33 = vrot.slane %v5602_v51, 2  ;;  %v1067_v42 = vrot.slane %v5637_v34, 2 }
  0xb2   : > { %4338 = vmatprep.mubr.msk.f32.mxu0 %vm419_vm1, %v5734_v13  ;;  %v1070_v56 = vrot.slane %v5648_v53, 2 }
  0xb4   : > { %4113 = vmatmul.mubr.msk.f32.gmra.mrb[30].mxu1 %vm419_vm1, %v5745_v19  ;;  %v1065_v19 = vrot.slane %v5613_v12, 2 }
  0xb5   : > { %4339 = vmatmul.mubr.msk.f32.gmra.mrb[14].mxu0 %vm419_vm1, %v5750_v17  ;;  %4117 = vmatprep.mubr.msk.f32.mxu1 %vm419_vm1, %v5269_v2 }
  0xb6   : > { %4341 = vmatprep.mubr.msk.f32.mxu0 %vm419_vm1, %v5754_v60  ;;  %v5826_v27 = vsel %vm998_vm2, %v1064_v36, %v1065_v19  ;;  %v5839_v34 = vsel %vm998_vm2, %v1065_v19, %v1067_v42  ;;  %v1074_v36 = vrot.slane %v5680_v38, 2  ;;  %v1077_v19 = vrot.slane %v5707_v47, 2 }
  0xb7   : > { %6746 = vst [vmem:[#allocation55_spill] sm:$0xff] %v5826_v27  ;;  %6747 = vst [vmem:[#allocation56_spill] sm:$0xff] %v5839_v34 }
  0xb8   : > { %4118 = vmatmul.mubr.msk.f32.vlgmr.msra.gmra.mrb[0].mxu1 %vm419_vm1, %v5273_v3  ;;  %v5866_v42 = vsel %vm998_vm2, %v1074_v36, %v1075_v4  ;;  %v5882_v47 = vsel %vm998_vm2, %v1075_v4, %v1077_v19  ;;  %v5909_v36 = vld [vmem:[#allocation5 + $0x40] sm:$0xff]  ;;  %v1002_v19 = vrot.slane %v5286_v11, 2  ;;  %v6755_v11 = vld [vmem:[#allocation34_spill] sm:$0xff] }
  0xb9   : > { %4166 = vmatpush3.msra.mxu1 %v5421_v61  ;;  %4342 = vmatmul.mubr.msk.f32.gmra.mrb[16].mxu0 %vm419_vm1, %v5767_v44  ;;  %v1060_v61 = vrot.slane %v5577_v10, 2  ;;  %6750 = vst [vmem:[#allocation59_spill] sm:$0xff] %v5866_v42  ;;  %6751 = vst [vmem:[#allocation60_spill] sm:$0xff] %v5882_v47 }
  0xba   : > { %4120 = vmatprep.mubr.msk.f32.mxu1 %vm419_vm1, %v5277_v6  ;;  %4344 = vmatprep.mubr.msk.f32.mxu0 %vm419_vm1, %v5771_v0  ;;  %v5853_v6 = vld [vmem:[%s5256_s21 + $0x188] sm:$0xff] }
  0xbb   : > { %4215 = vmatprep.subr.mxu1 %v5777_v23  ;;  %v5809_v14 = vsel %vm998_vm2, %v1059_v62, %v1060_v61  ;;  %v5822_v51 = vsel %vm998_vm2, %v1060_v61, %v1062_v33  ;;  %v1069_v62 = vrot.slane %v5645_v20, 2  ;;  %v1072_v61 = vrot.slane %v5672_v59, 2 }
  0xbc   : > { %4121 = vmatmul.mubr.msk.f32.gmra.mrb[2].mxu1 %vm419_vm1, %v5282_v8  ;;  %6745 = vst [vmem:[#allocation54_spill] sm:$0xff] %v5822_v51  ;;  %v5850_v8 = vld [vmem:[%s5256_s21 + $0x180] sm:$0xff] }
  0xbd   : > { %4345 = vmatmul.mubr.msk.f32.gmra.mrb[18].mxu0 %vm419_vm1, %v5787_v16  ;;  %4123 = vmatprep.mubr.msk.f32.mxu1 %vm419_vm1, %v5294_v15  ;;  %v5843_v33 = vsel %vm998_vm2, %v1069_v62, %v1070_v56  ;;  %v5862_v59 = vsel %vm998_vm2, %v1070_v56, %v1072_v61  ;;  %v1936_v62 = vrot.slane %v5850_v8, 2 }
  0xbe   : > { %4347 = vmatprep.mubr.msk.f32.mxu0 %vm419_vm1, %v5791_v48  ;;  %6748 = vst [vmem:[#allocation57_spill] sm:$0xff] %v5843_v33  ;;  %6749 = vst [vmem:[#allocation58_spill] sm:$0xff] %v5862_v59 }
  0xc0   : > { %4124 = vmatmul.mubr.msk.f32.gmra.mrb[4].mxu1 %vm419_vm1, %v5299_v18 }
  0xc1   : > { %4348 = vmatmul.mubr.msk.f32.gmra.mrb[20].mxu0 %vm419_vm1, %v5805_v55  ;;  %4126 = vmatprep.mubr.msk.f32.mxu1 %vm419_vm1, %v5311_v25 }
  0xc2   : > { %4350 = vmatprep.mubr.msk.f32.mxu0 %vm419_vm1, %v5809_v14 }
  0xc4   : > { %4127 = vmatmul.mubr.msk.f32.gmra.mrb[6].mxu1 %vm419_vm1, %v5314_v26 }
  0xc5   : > { %4351 = vmatmul.mubr.msk.f32.gmra.mrb[22].mxu0 %vm419_vm1, %v5822_v51  ;;  %4129 = vmatprep.mubr.msk.f32.mxu1 %vm419_vm1, %v5325_v31  ;;  %v5871_v51 = vld [vmem:[%s5256_s21 + $0x190] sm:$0x3] }
  0xc6   : > { %4353 = vmatprep.mubr.msk.f32.mxu0 %vm419_vm1, %v5826_v27  ;;  %v1937_v27 = vrot.slane %v5853_v6, 2  ;;  %v1939_v56 = vrot.slane %v5871_v51, 2 }
  0xc8   : > { %4130 = vmatmul.mubr.msk.f32.gmra.mrb[8].mxu1 %vm419_vm1, %v5328_v32  ;;  %v5886_v61 = vsel %vm998_vm2, %v1936_v62, %v1937_v27  ;;  %v5897_v4 = vsel %vm998_vm2, %v1937_v27, %v1939_v56  ;;  %v1000_v27 = vrot.slane %v5273_v3, 2  ;;  %v6754_v3 = vld [vmem:[#allocation32_spill] sm:$0xff]  ;;  %v6759_v56 = vld [vmem:[#allocation42_spill] sm:$0xff] }
  0xc9   : > { %4354 = vmatmul.mubr.msk.f32.gmra.mrb[24].mxu0 %vm419_vm1, %v5839_v34  ;;  %4132 = vmatprep.mubr.msk.f32.mxu1 %vm419_vm1, %v5351_v40  ;;  %6752 = vst [vmem:[#allocation61_spill] sm:$0xff] %v5886_v61  ;;  %6753 = vst [vmem:[#allocation62_spill] sm:$0xff] %v5897_v4 }
  0xca   : > { %4356 = vmatprep.mubr.msk.f32.mxu0 %vm419_vm1, %v5843_v33 }
  0xcc   : > { %4133 = vmatmul.mubr.msk.f32.gmra.mrb[10].mxu1 %vm419_vm1, %v5354_v41 }
  0xcd   : > { %4357 = vmatmul.mubr.msk.f32.gmra.mrb[26].mxu0 %vm419_vm1, %v5862_v59  ;;  %4135 = vmatprep.mubr.msk.f32.mxu1 %vm419_vm1, %v5380_v49 }
  0xce   : > { %4359 = vmatprep.mubr.msk.f32.mxu0 %vm419_vm1, %v5866_v42 }
  0xd0   : > { %4136 = vmatmul.mubr.msk.f32.gmra.mrb[12].mxu1 %vm419_vm1, %v5383_v50 }
  0xd1   : > { %4360 = vmatmul.mubr.msk.f32.gmra.mrb[28].mxu0 %vm419_vm1, %v5882_v47  ;;  %4138 = vmatprep.mubr.msk.f32.mxu1 %vm419_vm1, %v5406_v57 }
  0xd2   : > { %4362 = vmatprep.mubr.msk.f32.mxu0 %vm419_vm1, %v5886_v61  ;;  %v6763_v61 = vld [vmem:[#allocation17_spill] sm:$0xff] }
  0xd4   : > { %4139 = vmatmul.mubr.msk.f32.gmra.mrb[14].mxu1 %vm419_vm1, %v5409_v58 }
  0xd5   : > { %4363 = vmatmul.mubr.msk.f32.gmra.mrb[30].mxu0 %vm419_vm1, %v5897_v4  ;;  %4141 = vmatprep.mubr.msk.f32.mxu1 %vm419_vm1, %v5435_v5  ;;  %v6762_v4 = vld [vmem:[#allocation16_spill] sm:$0xff] }
  0xd6   : > { %4367 = vmatprep.mubr.msk.f32.mxu0 %vm419_vm1, %v5294_v15 }
  0xd8   : > { %4142 = vmatmul.mubr.msk.f32.gmra.mrb[16].mxu1 %vm419_vm1, %v5438_v7 }
  0xd9   : > { %4368 = vmatmul.mubr.msk.f32.vlgmr.msra.gmra.mrb[0].mxu0 %vm419_vm1, %v5299_v18  ;;  %4144 = vmatprep.mubr.msk.f32.mxu1 %vm419_vm1, %v5476_v28 }
  0xda   : > { %4416 = vmatpush3.msra.mxu0 %v5543_v30  ;;  %4370 = vmatprep.mubr.msk.f32.mxu0 %vm419_vm1, %v5311_v25  ;;  %v999_v30 = vrot.slane %v5269_v2, 2  ;;  %v1003_v2 = vsel %vm998_vm2, %v1000_v27, %v1002_v19  ;;  %v6761_v19 = vld [vmem:[#allocation48_spill] sm:$0xff] }
  0xdb   : > { %4465 = vmatprep.subr.mxu0 %v5909_v36 }
  0xdc   : > { %4145 = vmatmul.mubr.msk.f32.gmra.mrb[18].mxu1 %vm419_vm1, %v5479_v29  ;;  %v1001_v62 = vsel %vm998_vm2, %v999_v30, %v1000_v27  ;;  %v6760_v30 = vld [vmem:[#allocation44_spill] sm:$0xff] }
  0xdd   : > { %4371 = vmatmul.mubr.msk.f32.gmra.mrb[2].mxu0 %vm419_vm1, %v5314_v26  ;;  %4147 = vmatprep.mubr.msk.f32.mxu1 %vm419_vm1, %v5504_v52  ;;  %v6029_v27 = vld [vmem:[%s5256_s21 + $0x198] sm:$0xff] }
  0xde   : > { %4373 = vmatprep.mubr.msk.f32.mxu0 %vm419_vm1, %v5325_v31 }
  0xe0   : > { %4148 = vmatmul.mubr.msk.f32.gmra.mrb[20].mxu1 %vm419_vm1, %v5507_v54 }
  0xe1   : > { %4374 = vmatmul.mubr.msk.f32.gmra.mrb[4].mxu0 %vm419_vm1, %v5328_v32  ;;  %4150 = vmatprep.mubr.msk.f32.mxu1 %vm419_vm1, %v5536_v22 }
  0xe2   : > { %4376 = vmatprep.mubr.msk.f32.mxu0 %vm419_vm1, %v5351_v40 }
  0xe4   : > { %4151 = vmatmul.mubr.msk.f32.gmra.mrb[22].mxu1 %vm419_vm1, %v5539_v24 }
  0xe5   : > { %4377 = vmatmul.mubr.msk.f32.gmra.mrb[6].mxu0 %vm419_vm1, %v5354_v41  ;;  %4153 = vmatprep.mubr.msk.f32.mxu1 %vm419_vm1, %v5574_v9 }
  0xe6   : > { %4379 = vmatprep.mubr.msk.f32.mxu0 %vm419_vm1, %v5380_v49 }
  0xe8   : > { %4154 = vmatmul.mubr.msk.f32.gmra.mrb[24].mxu1 %vm419_vm1, %v5577_v10 }
  0xe9   : > { %4380 = vmatmul.mubr.msk.f32.gmra.mrb[8].mxu0 %vm419_vm1, %v5383_v50  ;;  %4156 = vmatprep.mubr.msk.f32.mxu1 %vm419_vm1, %v5610_v45 }
  0xea   : > { %4382 = vmatprep.mubr.msk.f32.mxu0 %vm419_vm1, %v5406_v57 }
  0xec   : > { %4157 = vmatmul.mubr.msk.f32.gmra.mrb[26].mxu1 %vm419_vm1, %v5613_v12 }
  0xed   : > { %4383 = vmatmul.mubr.msk.f32.gmra.mrb[10].mxu0 %vm419_vm1, %v5409_v58  ;;  %4159 = vmatprep.mubr.msk.f32.mxu1 %vm419_vm1, %v5645_v20 }
  0xee   : > { %4385 = vmatprep.mubr.msk.f32.mxu0 %vm419_vm1, %v5435_v5 }
  0xf0   : > { %4160 = vmatmul.mubr.msk.f32.gmra.mrb[28].mxu1 %vm419_vm1, %v5648_v53 }
  0xf1   : > { %4386 = vmatmul.mubr.msk.f32.gmra.mrb[12].mxu0 %vm419_vm1, %v5438_v7  ;;  %4162 = vmatprep.mubr.msk.f32.mxu1 %vm419_vm1, %v5680_v38 }
  0xf2   : > { %4388 = vmatprep.mubr.msk.f32.mxu0 %vm419_vm1, %v5476_v28 }
  0xf4   : > { %4163 = vmatmul.mubr.msk.f32.gmra.mrb[30].mxu1 %vm419_vm1, %v5683_v43 }
  0xf5   : > { %4389 = vmatmul.mubr.msk.f32.gmra.mrb[14].mxu0 %vm419_vm1, %v5479_v29  ;;  %4167 = vmatprep.mubr.msk.f32.mxu1 %vm419_vm1, %v1001_v62  ;;  %v6040_v62 = vld [vmem:[%s5256_s21 + $0x1a0] sm:$0xff] }
  0xf6   : > { %4391 = vmatprep.mubr.msk.f32.mxu0 %vm419_vm1, %v5504_v52 }
  0xf8   : > { %4168 = vmatmul.mubr.msk.f32.vlgmr.msra.gmra.mrb[0].mxu1 %vm419_vm1, %v1003_v2  ;;  %v3729_v2 = vld [vmem:[#allocation7 + $0x1] ss:$0 sm:$0xff] }
  0xf9   : > { %4216 = vmatpush3.msra.mxu1 %v5777_v23  ;;  %4392 = vmatmul.mubr.msk.f32.gmra.mrb[16].mxu0 %vm419_vm1, %v5507_v54  ;;  %v6758_v23 = vld [vmem:[#allocation40_spill] sm:$0xff] }
  0xfa   : > { %4170 = vmatprep.mubr.msk.f32.mxu1 %vm419_vm1, %v5499_v46  ;;  %4394 = vmatprep.mubr.msk.f32.mxu0 %vm419_vm1, %v5536_v22  ;;  %v6756_v46 = vld [vmem:[#allocation36_spill] sm:$0xff] }
  0xfb   : > { %4515 = vmatprep.subr.mxu1 %v5266_v1  ;;  %3085 = vrot.lane.b32.xlu0 %v3729_v2, %s5031_s20  ;;  %v6766_v2 = vld [vmem:[#allocation20_spill] sm:$0xff] }
  0xfc   : > { %4171 = vmatmul.mubr.msk.f32.gmra.mrb[2].mxu1 %vm419_vm1, %v5520_v63  ;;  %v6757_v63 = vld [vmem:[#allocation38_spill] sm:$0xff] }
  0xfd   : > { %4395 = vmatmul.mubr.msk.f32.gmra.mrb[18].mxu0 %vm419_vm1, %v5539_v24  ;;  %4173 = vmatprep.mubr.msk.f32.mxu1 %vm419_vm1, %v5531_v21 }
  0xfe   : > { %4397 = vmatprep.mubr.msk.f32.mxu0 %vm419_vm1, %v5574_v9 }
 0x100   : > { %4174 = vmatmul.mubr.msk.f32.gmra.mrb[4].mxu1 %vm419_vm1, %v6754_v3 }
 0x101   : > { %4398 = vmatmul.mubr.msk.f32.gmra.mrb[20].mxu0 %vm419_vm1, %v5577_v10  ;;  %4176 = vmatprep.mubr.msk.f32.mxu1 %vm419_vm1, %v6755_v11 }
 0x102   : > { %4400 = vmatprep.mubr.msk.f32.mxu0 %vm419_vm1, %v5610_v45 }
 0x104   : > { %4177 = vmatmul.mubr.msk.f32.gmra.mrb[6].mxu1 %vm419_vm1, %v6756_v46 }
 0x105   : > { %4401 = vmatmul.mubr.msk.f32.gmra.mrb[22].mxu0 %vm419_vm1, %v5613_v12  ;;  %4179 = vmatprep.mubr.msk.f32.mxu1 %vm419_vm1, %v6757_v63 }
 0x106   : > { %4403 = vmatprep.mubr.msk.f32.mxu0 %vm419_vm1, %v5645_v20 }
 0x108   : > { %4180 = vmatmul.mubr.msk.f32.gmra.mrb[8].mxu1 %vm419_vm1, %v6758_v23 }
 0x109   : > { %4404 = vmatmul.mubr.msk.f32.gmra.mrb[24].mxu0 %vm419_vm1, %v5648_v53  ;;  %4182 = vmatprep.mubr.msk.f32.mxu1 %vm419_vm1, %v6759_v56 }
 0x10a   : > { %4406 = vmatprep.mubr.msk.f32.mxu0 %vm419_vm1, %v5680_v38 }
 0x10c   : > { %4183 = vmatmul.mubr.msk.f32.gmra.mrb[10].mxu1 %vm419_vm1, %v6760_v30 }
 0x10d   : > { %4407 = vmatmul.mubr.msk.f32.gmra.mrb[26].mxu0 %vm419_vm1, %v5683_v43  ;;  %4185 = vmatprep.mubr.msk.f32.mxu1 %vm419_vm1, %v5675_v35  ;;  %v6764_v43 = vld [vmem:[#allocation18_spill] sm:$0xff] }
 0x10e   : > { %4409 = vmatprep.mubr.msk.f32.mxu0 %vm419_vm1, %v5850_v8 }
 0x110   : > { %4186 = vmatmul.mubr.msk.f32.gmra.mrb[12].mxu1 %vm419_vm1, %v6761_v19 }
 0x111   : > { %4410 = vmatmul.mubr.msk.f32.gmra.mrb[28].mxu0 %vm419_vm1, %v5853_v6  ;;  %4188 = vmatprep.mubr.msk.f32.mxu1 %vm419_vm1, %v5710_v37 }
 0x112   : > { %4412 = vmatprep.mubr.msk.f32.mxu0 %vm419_vm1, %v6029_v27 }
 0x114   : > { %4189 = vmatmul.mubr.msk.f32.gmra.mrb[14].mxu1 %vm419_vm1, %v5727_v39 }
 0x115   : > { %4413 = vmatmul.mubr.msk.f32.gmra.mrb[30].mxu0 %vm419_vm1, %v6040_v62  ;;  %4191 = vmatprep.mubr.msk.f32.mxu1 %vm419_vm1, %v5734_v13 }
 0x116   : > { %4417 = vmatprep.mubr.msk.f32.mxu0 %vm419_vm1, %v6762_v4  ;;  %v6765_v4 = vld [vmem:[#allocation19_spill] sm:$0xff] }
 0x118   : > { %4192 = vmatmul.mubr.msk.f32.gmra.mrb[16].mxu1 %vm419_vm1, %v5750_v17 }
 0x119   : > { %4418 = vmatmul.mubr.msk.f32.vlgmr.msra.gmra.mrb[0].mxu0 %vm419_vm1, %v6763_v61  ;;  %4194 = vmatprep.mubr.msk.f32.mxu1 %vm419_vm1, %v5754_v60  ;;  %v6767_v61 = vld [vmem:[#allocation21_spill] sm:$0xff] }
 0x11a   : > { %4466 = vmatpush3.msra.mxu0 %v5909_v36  ;;  %4420 = vmatprep.mubr.msk.f32.mxu0 %vm419_vm1, %v6764_v43  ;;  %v6768_v43 = vld [vmem:[#allocation22_spill] sm:$0xff]  ;;  %v6769_v36 = vld [vmem:[#allocation23_spill] sm:$0xff] }
 0x11c   : > { %4195 = vmatmul.mubr.msk.f32.gmra.mrb[18].mxu1 %vm419_vm1, %v5767_v44 }
 0x11d   : > { %4421 = vmatmul.mubr.msk.f32.gmra.mrb[2].mxu0 %vm419_vm1, %v6765_v4  ;;  %4197 = vmatprep.mubr.msk.f32.mxu1 %vm419_vm1, %v5771_v0  ;;  %v6770_v4 = vld [vmem:[#allocation24_spill] sm:$0xff] }
 0x11e   : > { %4423 = vmatprep.mubr.msk.f32.mxu0 %vm419_vm1, %v6766_v2  ;;  %v6771_v2 = vld [vmem:[#allocation54_spill] sm:$0xff] }
 0x120   : > { %4198 = vmatmul.mubr.msk.f32.gmra.mrb[20].mxu1 %vm419_vm1, %v5787_v16 }
 0x121   : > { %4424 = vmatmul.mubr.msk.f32.gmra.mrb[4].mxu0 %vm419_vm1, %v6767_v61  ;;  %4200 = vmatprep.mubr.msk.f32.mxu1 %vm419_vm1, %v5791_v48  ;;  %v6772_v61 = vld [vmem:[#allocation25_spill] sm:$0xff]  ;;  %v6773_v48 = vld [vmem:[#allocation55_spill] sm:$0xff] }
 0x122   : > { %4426 = vmatprep.mubr.msk.f32.mxu0 %vm419_vm1, %v6768_v43  ;;  %v6774_v43 = vld [vmem:[#allocation26_spill] sm:$0xff] }
 0x124   : > { %4201 = vmatmul.mubr.msk.f32.gmra.mrb[22].mxu1 %vm419_vm1, %v5805_v55 }
 0x125   : > { %4427 = vmatmul.mubr.msk.f32.gmra.mrb[6].mxu0 %vm419_vm1, %v6769_v36  ;;  %4203 = vmatprep.mubr.msk.f32.mxu1 %vm419_vm1, %v5809_v14  ;;  %v6775_v36 = vld [vmem:[#allocation27_spill] sm:$0xff] }
 0x126   : > { %4429 = vmatprep.mubr.msk.f32.mxu0 %vm419_vm1, %v6770_v4  ;;  %v6776_v4 = vld [vmem:[#allocation28_spill] sm:$0xff] }
 0x128   : > { %4204 = vmatmul.mubr.msk.f32.gmra.mrb[24].mxu1 %vm419_vm1, %v6771_v2 }
 0x129   : > { %4430 = vmatmul.mubr.msk.f32.gmra.mrb[8].mxu0 %vm419_vm1, %v6772_v61  ;;  %4206 = vmatprep.mubr.msk.f32.mxu1 %vm419_vm1, %v6773_v48  ;;  %v6777_v61 = vld [vmem:[#allocation29_spill] sm:$0xff] }
 0x12a   : > { %4432 = vmatprep.mubr.msk.f32.mxu0 %vm419_vm1, %v6774_v43  ;;  %v6778_v43 = vld [vmem:[#allocation30_spill] sm:$0xff] }
 0x12c   : > { %4207 = vmatmul.mubr.msk.f32.gmra.mrb[26].mxu1 %vm419_vm1, %v5839_v34  ;;  %v6165_v34 = vld [vmem:[%s5256_s21 + $0x1a8] sm:$0x3] }
 0x12d   : > { %4433 = vmatmul.mubr.msk.f32.gmra.mrb[10].mxu0 %vm419_vm1, %v6775_v36  ;;  %4209 = vmatprep.mubr.msk.f32.mxu1 %vm419_vm1, %v5843_v33  ;;  %v6779_v36 = vld [vmem:[#allocation31_spill] sm:$0xff]  ;;  %v6780_v33 = vld [vmem:[#allocation14_spill] sm:$0xff] }
 0x12e   : > { %4435 = vmatprep.mubr.msk.f32.mxu0 %vm419_vm1, %v6776_v4  ;;  %v6781_v4 = vld [vmem:[#allocation33_spill] sm:$0xff] }
 0x130   : > { %4210 = vmatmul.mubr.msk.f32.gmra.mrb[28].mxu1 %vm419_vm1, %v5862_v59  ;;  %v6782_v59 = vld [vmem:[#allocation15_spill] sm:$0xff] }
 0x131   : > { %4436 = vmatmul.mubr.msk.f32.gmra.mrb[12].mxu0 %vm419_vm1, %v6777_v61  ;;  %4212 = vmatprep.mubr.msk.f32.mxu1 %vm419_vm1, %v5866_v42  ;;  %v6783_v61 = vld [vmem:[#allocation35_spill] sm:$0xff]  ;;  %v6791_v42 = vld [vmem:[#allocation50_spill] sm:$0xff] }
 0x132   : > { %4438 = vmatprep.mubr.msk.f32.mxu0 %vm419_vm1, %v6778_v43 }
 0x134   : > { %4213 = vmatmul.mubr.msk.f32.gmra.mrb[30].mxu1 %vm419_vm1, %v5882_v47  ;;  %v6784_v47 = vld [vmem:[#allocation37_spill] sm:$0xff] }
 0x135   : > { %4439 = vmatmul.mubr.msk.f32.gmra.mrb[14].mxu0 %vm419_vm1, %v6779_v36  ;;  %4217 = vmatprep.mubr.msk.f32.mxu1 %vm419_vm1, %v6780_v33  ;;  %v6785_v33 = vld [vmem:[#allocation39_spill] sm:$0xff] }
 0x136   : > { %4441 = vmatprep.mubr.msk.f32.mxu0 %vm419_vm1, %v6781_v4 }
 0x138   : > { %4218 = vmatmul.mubr.msk.f32.vlgmr.msra.gmra.mrb[0].mxu1 %vm419_vm1, %v6782_v59  ;;  %v6786_v59 = vld [vmem:[#allocation41_spill] sm:$0xff] }
 0x139   : > { %4516 = vmatpush3.msra.mxu1 %v5266_v1  ;;  %4442 = vmatmul.mubr.msk.f32.gmra.mrb[16].mxu0 %vm419_vm1, %v6783_v61  ;;  %v6787_v1 = vld [vmem:[#allocation43_spill] sm:$0xff] }
 0x13a   : > { %4220 = vmatprep.mubr.msk.f32.mxu1 %vm419_vm1, %v5294_v15  ;;  %4444 = vmatprep.mubr.msk.f32.mxu0 %vm419_vm1, %v6784_v47  ;;  %v6788_v15 = vld [vmem:[#allocation45_spill] sm:$0xff] }
 0x13c   : > { %4221 = vmatmul.mubr.msk.f32.gmra.mrb[2].mxu1 %vm419_vm1, %v5299_v18  ;;  %v6789_v18 = vld [vmem:[#allocation47_spill] sm:$0xff] }
 0x13d   : > { %4445 = vmatmul.mubr.msk.f32.gmra.mrb[18].mxu0 %vm419_vm1, %v6785_v33  ;;  %4223 = vmatprep.mubr.msk.f32.mxu1 %vm419_vm1, %v5311_v25  ;;  %v6790_v25 = vld [vmem:[#allocation49_spill] sm:$0xff] }
 0x13e   : > { %4447 = vmatprep.mubr.msk.f32.mxu0 %vm419_vm1, %v6786_v59 }
 0x140   : > { %4224 = vmatmul.mubr.msk.f32.gmra.mrb[4].mxu1 %vm419_vm1, %v5314_v26  ;;  %v1668_v26 = vrot.slane %v5850_v8, 1 }
 0x141   : > { %4448 = vmatmul.mubr.msk.f32.gmra.mrb[20].mxu0 %vm419_vm1, %v6787_v1  ;;  %4226 = vmatprep.mubr.msk.f32.mxu1 %vm419_vm1, %v5325_v31  ;;  %v1669_v31 = vrot.slane %v5853_v6, 1 }
 0x142   : > { %4450 = vmatprep.mubr.msk.f32.mxu0 %vm419_vm1, %v6788_v15 }
 0x143   : > { %v6162_v15 = vsel %vm336_vm0, %v1668_v26, %v1669_v31 }
 0x144   : > { %4227 = vmatmul.mubr.msk.f32.gmra.mrb[6].mxu1 %vm419_vm1, %v5328_v32  ;;  %v6792_v32 = vld [vmem:[#allocation51_spill] sm:$0xff] }
 0x145   : > { %4451 = vmatmul.mubr.msk.f32.gmra.mrb[22].mxu0 %vm419_vm1, %v6789_v18  ;;  %4229 = vmatprep.mubr.msk.f32.mxu1 %vm419_vm1, %v5351_v40  ;;  %v1671_v40 = vrot.slane %v5871_v51, 1  ;;  %v2471_v18 = vrot.slane %v6040_v62, 1  ;;  %v2473_v51 = vrot.slane %v6165_v34, 1 }
 0x146   : > { %4453 = vmatprep.mubr.msk.f32.mxu0 %vm419_vm1, %v6790_v25  ;;  %v2470_v25 = vrot.slane %v6029_v27, 1 }
 0x148   : > { %4230 = vmatmul.mubr.msk.f32.gmra.mrb[8].mxu1 %vm419_vm1, %v5354_v41  ;;  %v6793_v41 = vld [vmem:[#allocation52_spill] sm:$0xff]  ;;  %v2472_v26 = vsel %vm336_vm0, %v2470_v25, %v2471_v18 }
 0x149   : > { %4454 = vmatmul.mubr.msk.f32.gmra.mrb[24].mxu0 %vm419_vm1, %v6791_v42  ;;  %4232 = vmatprep.mubr.msk.f32.mxu1 %vm419_vm1, %v5380_v49  ;;  %v6176_v49 = vsel %vm336_vm0, %v1669_v31, %v1671_v40 }
 0x14a   : > { %4456 = vmatprep.mubr.msk.f32.mxu0 %vm419_vm1, %v6792_v32 }
 0x14c   : > { %4233 = vmatmul.mubr.msk.f32.gmra.mrb[10].mxu1 %vm419_vm1, %v5383_v50  ;;  %v2474_v50 = vsel %vm336_vm0, %v2471_v18, %v2473_v51 }
 0x14d   : > { %4457 = vmatmul.mubr.msk.f32.gmra.mrb[26].mxu0 %vm419_vm1, %v6793_v41  ;;  %4235 = vmatprep.mubr.msk.f32.mxu1 %vm419_vm1, %v5406_v57  ;;  %v6797_v57 = vld [vmem:[#allocation45_spill] sm:$0xff] }
 0x14e   : > { %4459 = vmatprep.mubr.msk.f32.mxu0 %vm419_vm1, %v6162_v15 }
 0x150   : > { %4236 = vmatmul.mubr.msk.f32.gmra.mrb[12].mxu1 %vm419_vm1, %v5409_v58  ;;  %v6798_v58 = vld [vmem:[#allocation57_spill] sm:$0xff] }
 0x151   : > { %4460 = vmatmul.mubr.msk.f32.gmra.mrb[28].mxu0 %vm419_vm1, %v6176_v49  ;;  %4238 = vmatprep.mubr.msk.f32.mxu1 %vm419_vm1, %v5435_v5  ;;  %v6799_v5 = vld [vmem:[#allocation47_spill] sm:$0xff] }
 0x152   : > { %4462 = vmatprep.mubr.msk.f32.mxu0 %vm419_vm1, %v2472_v26 }
 0x154   : > { %4239 = vmatmul.mubr.msk.f32.gmra.mrb[14].mxu1 %vm419_vm1, %v5438_v7  ;;  %v6800_v7 = vld [vmem:[#allocation58_spill] sm:$0xff] }
 0x155   : > { %4463 = vmatmul.mubr.msk.f32.gmra.mrb[30].mxu0 %vm419_vm1, %v2474_v50  ;;  %4241 = vmatprep.mubr.msk.f32.mxu1 %vm419_vm1, %v5476_v28  ;;  %v2738_v28 = vrot.slane %v6029_v27, 2 }
 0x156   : > { %4467 = vmatprep.mubr.msk.f32.mxu0 %vm419_vm1, %v5531_v21  ;;  %v2741_v21 = vrot.slane %v6165_v34, 2 }
 0x158   : > { %4242 = vmatmul.mubr.msk.f32.gmra.mrb[16].mxu1 %vm419_vm1, %v5479_v29  ;;  %v2739_v29 = vrot.slane %v6040_v62, 2 }
 0x159   : > { %4468 = vmatmul.mubr.msk.f32.vlgmr.msra.gmra.mrb[0].mxu0 %vm419_vm1, %v6754_v3  ;;  %4244 = vmatprep.mubr.msk.f32.mxu1 %vm419_vm1, %v5504_v52  ;;  %v6803_v52 = vld [vmem:[#allocation60_spill] sm:$0xff] }
 0x15a   : > { %4470 = vmatprep.mubr.msk.f32.mxu0 %vm419_vm1, %v6755_v11 }
 0x15c   : > { %4245 = vmatmul.mubr.msk.f32.gmra.mrb[18].mxu1 %vm419_vm1, %v5507_v54  ;;  %v6804_v54 = vld [vmem:[#allocation61_spill] sm:$0xff] }
 0x15d   : > { %4471 = vmatmul.mubr.msk.f32.gmra.mrb[2].mxu0 %vm419_vm1, %v6756_v46  ;;  %4247 = vmatprep.mubr.msk.f32.mxu1 %vm419_vm1, %v5536_v22  ;;  %v6802_v22 = vld [vmem:[#allocation59_spill] sm:$0xff] }
 0x15e   : > { %4473 = vmatprep.mubr.msk.f32.mxu0 %vm419_vm1, %v6757_v63 }
 0x160   : > { %4248 = vmatmul.mubr.msk.f32.gmra.mrb[20].mxu1 %vm419_vm1, %v5539_v24  ;;  %v2740_v24 = vsel %vm998_vm2, %v2738_v28, %v2739_v29 }
 0x161   : > { %4474 = vmatmul.mubr.msk.f32.gmra.mrb[4].mxu0 %vm419_vm1, %v6758_v23  ;;  %4250 = vmatprep.mubr.msk.f32.mxu1 %vm419_vm1, %v5574_v9  ;;  %v6801_v9 = vld [vmem:[#allocation49_spill] sm:$0xff] }
 0x162   : > { %4476 = vmatprep.mubr.msk.f32.mxu0 %vm419_vm1, %v6759_v56 }
 0x164   : > { %4251 = vmatmul.mubr.msk.f32.gmra.mrb[22].mxu1 %vm419_vm1, %v5577_v10  ;;  %v6805_v10 = vld [vmem:[#allocation62_spill] sm:$0xff] }
 0x165   : > { %4477 = vmatmul.mubr.msk.f32.gmra.mrb[6].mxu0 %vm419_vm1, %v6760_v30  ;;  %4253 = vmatprep.mubr.msk.f32.mxu1 %vm419_vm1, %v5610_v45  ;;  %v6794_v45 = vld [vmem:[#allocation46_spill] sm:$0xff] }
 0x166   : > { %4479 = vmatprep.mubr.msk.f32.mxu0 %vm419_vm1, %v5675_v35 }
 0x168   : > { %4254 = vmatmul.mubr.msk.f32.gmra.mrb[24].mxu1 %vm419_vm1, %v5613_v12  ;;  %v2742_v12 = vsel %vm998_vm2, %v2739_v29, %v2741_v21 }
 0x169   : > { %4480 = vmatmul.mubr.msk.f32.gmra.mrb[8].mxu0 %vm419_vm1, %v6761_v19  ;;  %4256 = vmatprep.mubr.msk.f32.mxu1 %vm419_vm1, %v5645_v20 }
 0x16a   : > { %4482 = vmatprep.mubr.msk.f32.mxu0 %vm419_vm1, %v5710_v37 }
 0x16c   : > { %4257 = vmatmul.mubr.msk.f32.gmra.mrb[26].mxu1 %vm419_vm1, %v5648_v53 }
 0x16d   : > { %4483 = vmatmul.mubr.msk.f32.gmra.mrb[10].mxu0 %vm419_vm1, %v5727_v39  ;;  %4259 = vmatprep.mubr.msk.f32.mxu1 %vm419_vm1, %v5680_v38  ;;  %v6337_v3 = vpop.permute.xlu0 %3085 }
 0x16e   : > { %4485 = vmatprep.mubr.msk.f32.mxu0 %vm419_vm1, %v5734_v13 }
 0x170   : > { %4260 = vmatmul.mubr.msk.f32.gmra.mrb[28].mxu1 %vm419_vm1, %v6794_v45 }
 0x171   : > { %4486 = vmatmul.mubr.msk.f32.gmra.mrb[12].mxu0 %vm419_vm1, %v5750_v17  ;;  %4262 = vmatprep.mubr.msk.f32.mxu1 %vm419_vm1, %v5850_v8  ;;  %v6795_v8 = vld [vmem:[#allocation53_spill] sm:$0xff] }
 0x172   : > { %4488 = vmatprep.mubr.msk.f32.mxu0 %vm419_vm1, %v5754_v60 }
 0x174   : > { %4263 = vmatmul.mubr.msk.f32.gmra.mrb[30].mxu1 %vm419_vm1, %v5853_v6  ;;  %v6796_v6 = vld [vmem:[#allocation56_spill] sm:$0xff] }
 0x175   : > { %4489 = vmatmul.mubr.msk.f32.gmra.mrb[14].mxu0 %vm419_vm1, %v5767_v44  ;;  %4291 = vmatprep.mubr.msk.f32.mxu1 %vm419_vm1, %v6778_v43 }
 0x176   : > { %4491 = vmatprep.mubr.msk.f32.mxu0 %vm419_vm1, %v5771_v0 }
 0x178   : > { %4292 = vmatmul.mubr.msk.f32.vlgmr.msra.gmra.mrb[16].mxu1 %vm419_vm1, %v6779_v36 }
 0x179   : > { %4492 = vmatmul.mubr.msk.f32.gmra.mrb[16].mxu0 %vm419_vm1, %v5787_v16  ;;  %4294 = vmatprep.mubr.msk.f32.mxu1 %vm419_vm1, %v6781_v4 }
 0x17a   : > { %4494 = vmatprep.mubr.msk.f32.mxu0 %vm419_vm1, %v6795_v8 }
 0x17c   : > { %4295 = vmatmul.mubr.msk.f32.gmra.mrb[18].mxu1 %vm419_vm1, %v6783_v61 }
 0x17d   : > { %4495 = vmatmul.mubr.msk.f32.gmra.mrb[18].mxu0 %vm419_vm1, %v5805_v55  ;;  %4297 = vmatprep.mubr.msk.f32.mxu1 %vm419_vm1, %v6784_v47  ;;  %v6335_v47 = vld [vmem:[#allocation7] ss:$0 sm:$0xff] }
 0x17e   : > { %4497 = vmatprep.mubr.msk.f32.mxu0 %vm419_vm1, %v5809_v14 }
 0x180   : > { %4298 = vmatmul.mubr.msk.f32.gmra.mrb[20].mxu1 %vm419_vm1, %v6785_v33 }
 0x181   : > { %4498 = vmatmul.mubr.msk.f32.gmra.mrb[20].mxu0 %vm419_vm1, %v6771_v2  ;;  %4300 = vmatprep.mubr.msk.f32.mxu1 %vm419_vm1, %v6786_v59 }
 0x182   : > { %4500 = vmatprep.mubr.msk.f32.mxu0 %vm419_vm1, %v6773_v48 }
 0x184   : > { %4301 = vmatmul.mubr.msk.f32.gmra.mrb[22].mxu1 %vm419_vm1, %v6787_v1 }
 0x185   : > { %4501 = vmatmul.mubr.msk.f32.gmra.mrb[22].mxu0 %vm419_vm1, %v6796_v6  ;;  %4303 = vmatprep.mubr.msk.f32.mxu1 %vm419_vm1, %v6797_v57 }
 0x186   : > { %4503 = vmatprep.mubr.msk.f32.mxu0 %vm419_vm1, %v6798_v58 }
 0x188   : > { %4304 = vmatmul.mubr.msk.f32.gmra.mrb[24].mxu1 %vm419_vm1, %v6799_v5 }
 0x189   : > { %4504 = vmatmul.mubr.msk.f32.gmra.mrb[24].mxu0 %vm419_vm1, %v6800_v7  ;;  %4306 = vmatprep.mubr.msk.f32.mxu1 %vm419_vm1, %v6801_v9 }
 0x18a   : > { %4506 = vmatprep.mubr.msk.f32.mxu0 %vm419_vm1, %v6802_v22 }
 0x18c   : > { %4307 = vmatmul.mubr.msk.f32.gmra.mrb[26].mxu1 %vm419_vm1, %v6791_v42 }
 0x18d   : > { %4507 = vmatmul.mubr.msk.f32.gmra.mrb[26].mxu0 %vm419_vm1, %v6803_v52  ;;  %4309 = vmatprep.mubr.msk.f32.mxu1 %vm419_vm1, %v6792_v32 }
 0x18e   : > { %4509 = vmatprep.mubr.msk.f32.mxu0 %vm419_vm1, %v6804_v54 }
 0x190   : > { %4310 = vmatmul.mubr.msk.f32.gmra.mrb[28].mxu1 %vm419_vm1, %v6793_v41 }
 0x191   : > { %4510 = vmatmul.mubr.msk.f32.gmra.mrb[28].mxu0 %vm419_vm1, %v6805_v10  ;;  %4312 = vmatprep.mubr.msk.f32.mxu1 %vm419_vm1, %v6162_v15 }
 0x192   : > { %4512 = vmatprep.mubr.msk.f32.mxu0 %vm419_vm1, %v2740_v24 }
 0x194   : > { %4313 = vmatmul.mubr.msk.f32.gmra.mrb[30].mxu1 %vm419_vm1, %v6176_v49 }
 0x195   : > { %4513 = vmatmul.mubr.msk.f32.gmra.mrb[30].mxu0 %vm419_vm1, %v2742_v12 }
 0x20b   : > { %v4219_v38 = vpop.f32.mrb[0].mxu1 }
 0x20c   : > { %v1476_v20 = vpop.f32.mrb[1].mxu1 }
 0x20f   : > { %v4222_v53 = vpop.f32.mrb[2].mxu1 }
 0x210   : > { %v1486_v35 = vpop.f32.mrb[3].mxu1 }
 0x213   : > { %v4225_v13 = vpop.f32.mrb[4].mxu1 }
 0x214   : > { %v1496_v37 = vpop.f32.mrb[5].mxu1 }
 0x217   : > { %v4228_v39 = vpop.f32.mrb[6].mxu1 }
 0x218   : > { %v1506_v17 = vpop.f32.mrb[7].mxu1 }
 0x21b   : > { %v4231_v60 = vpop.f32.mrb[8].mxu1 }
 0x21c   : > { %v1516_v44 = vpop.f32.mrb[9].mxu1 }
 0x21f   : > { %v6322_v0 = vpop.f32.mrb[10].mxu1 }
 0x220   : > { %v6324_v16 = vpop.f32.mrb[11].mxu1 }
 0x223   : > { %v6326_v48 = vpop.f32.mrb[12].mxu1 }
 0x224   : > { %v6328_v55 = vpop.f32.mrb[13].mxu1 }
 0x227   : > { %v6330_v14 = vpop.f32.mrb[14].mxu1 }
 0x228   : > { %v6332_v34 = vpop.f32.mrb[15].mxu1 }
 0x22c   : > { %v4469_v42 = vpop.f32.mrb[0].mxu0 }
 0x22d   : > { %v4517_v11 = vadd.f32 %v4469_v42, %v4219_v38  ;;  %v2815_v46 = vpop.f32.mrb[1].mxu0 }
 0x22e   : > { %v4518_v63 = vadd.f32 %v2815_v46, %v1476_v20 }
 0x22f   : > { %v3014_v23 = vadd.f32 %v4517_v11, %v6335_v47  ;;  %v3089_v56 = vadd.f32 %v4517_v11, %v6337_v3 }
 0x230   : > { %v3013_v30 = vadd.f32 %v4518_v63, %v6335_v47  ;;  %v4472_v27 = vpop.f32.mrb[2].mxu0  ;;  %v3088_v19 = vadd.f32 %v4518_v63, %v6337_v3 }
 0x231   : > { %3047 = vst.msk [vmem:[%s6343_s24 + $0x8] sm:$0xff] %vm3045_vm3, %v3014_v23  ;;  %v4519_v62 = vadd.f32 %v4472_v27, %v4222_v53  ;;  %v2825_v2 = vpop.f32.mrb[3].mxu0  ;;  %3154 = vrot.lane.b32.xlu1 %v3089_v56, %s5032_s11 }
 0x232   : > { %3046 = vst.msk [vmem:[%s6343_s24] sm:$0xff] %vm3045_vm3, %v3013_v30  ;;  %v4520_v43 = vadd.f32 %v2825_v2, %v1486_v35  ;;  %3152 = vrot.lane.b32.xlu0 %v3088_v19, %s5032_s11 }
 0x233   : > { %v3016_v36 = vadd.f32 %v4519_v62, %v6335_v47  ;;  %v3091_v4 = vadd.f32 %v4519_v62, %v6337_v3 }
 0x234   : > { %v3015_v61 = vadd.f32 %v4520_v43, %v6335_v47  ;;  %v3090_v33 = vadd.f32 %v4520_v43, %v6337_v3  ;;  %v4475_v59 = vpop.f32.mrb[4].mxu0 }
 0x235   : > { %3049 = vst.msk [vmem:[%s6343_s24 + $0x18] sm:$0xff] %vm3045_vm3, %v3016_v36  ;;  %v4521_v1 = vadd.f32 %v4475_v59, %v4225_v13  ;;  %v2835_v15 = vpop.f32.mrb[5].mxu0 }
 0x236   : > { %3048 = vst.msk [vmem:[%s6343_s24 + $0x10] sm:$0xff] %vm3045_vm3, %v3015_v61  ;;  %v4522_v18 = vadd.f32 %v2835_v15, %v1496_v37  ;;  %3158 = vrot.lane.b32.xlu0 %v3091_v4, %s5032_s11  ;;  %3156 = vrot.lane.b32.xlu1 %v3090_v33, %s5032_s11 }
 0x237   : > { %v3018_v25 = vadd.f32 %v4521_v1, %v6335_v47  ;;  %v3093_v31 = vadd.f32 %v4521_v1, %v6337_v3 }
 0x238   : > { %v3017_v32 = vadd.f32 %v4522_v18, %v6335_v47  ;;  %v3092_v40 = vadd.f32 %v4522_v18, %v6337_v3  ;;  %v4478_v41 = vpop.f32.mrb[6].mxu0 }
 0x239   : > { %3051 = vst.msk [vmem:[%s6343_s24 + $0x28] sm:$0xff] %vm3045_vm3, %v3018_v25  ;;  %v4523_v49 = vadd.f32 %v4478_v41, %v4228_v39  ;;  %v2845_v51 = vpop.f32.mrb[7].mxu0 }
 0x23a   : > { %3050 = vst.msk [vmem:[%s6343_s24 + $0x20] sm:$0xff] %vm3045_vm3, %v3017_v32  ;;  %v4524_v26 = vadd.f32 %v2845_v51, %v1506_v17  ;;  %3162 = vrot.lane.b32.xlu0 %v3093_v31, %s5032_s11  ;;  %3160 = vrot.lane.b32.xlu1 %v3092_v40, %s5032_s11 }
 0x23b   : > { %v3020_v50 = vadd.f32 %v4523_v49, %v6335_v47  ;;  %v3095_v45 = vadd.f32 %v4523_v49, %v6337_v3 }
 0x23c   : > { %v3019_v8 = vadd.f32 %v4524_v26, %v6335_v47  ;;  %v3094_v6 = vadd.f32 %v4524_v26, %v6337_v3  ;;  %v4481_v57 = vpop.f32.mrb[8].mxu0 }
 0x23d   : > { %3053 = vst.msk [vmem:[%s6343_s24 + $0x38] sm:$0xff] %vm3045_vm3, %v3020_v50  ;;  %v4525_v58 = vadd.f32 %v4481_v57, %v4231_v60  ;;  %v2855_v5 = vpop.f32.mrb[9].mxu0 }
 0x23e   : > { %3052 = vst.msk [vmem:[%s6343_s24 + $0x30] sm:$0xff] %vm3045_vm3, %v3019_v8  ;;  %v4526_v7 = vadd.f32 %v2855_v5, %v1516_v44  ;;  %3166 = vrot.lane.b32.xlu0 %v3095_v45, %s5032_s11  ;;  %3164 = vrot.lane.b32.xlu1 %v3094_v6, %s5032_s11 }
 0x23f   : > { %v3022_v9 = vadd.f32 %v4525_v58, %v6335_v47  ;;  %v3097_v22 = vadd.f32 %v4525_v58, %v6337_v3 }
 0x240   : > { %v3021_v28 = vadd.f32 %v4526_v7, %v6335_v47  ;;  %v3096_v29 = vadd.f32 %v4526_v7, %v6337_v3  ;;  %v4484_v52 = vpop.f32.mrb[10].mxu0 }
 0x241   : > { %3055 = vst.msk [vmem:[%s6343_s24 + $0x48] sm:$0xff] %vm3045_vm3, %v3022_v9  ;;  %v4527_v54 = vadd.f32 %v4484_v52, %v6322_v0  ;;  %v2865_v21 = vpop.f32.mrb[11].mxu0 }
 0x242   : > { %3054 = vst.msk [vmem:[%s6343_s24 + $0x40] sm:$0xff] %vm3045_vm3, %v3021_v28  ;;  %v4528_v24 = vadd.f32 %v2865_v21, %v6324_v16  ;;  %3170 = vrot.lane.b32.xlu0 %v3097_v22, %s5032_s11  ;;  %3168 = vrot.lane.b32.xlu1 %v3096_v29, %s5032_s11 }
 0x243   : > { %v3024_v10 = vadd.f32 %v4527_v54, %v6335_v47  ;;  %v3099_v12 = vadd.f32 %v4527_v54, %v6337_v3 }
 0x244   : > { %v3023_v38 = vadd.f32 %v4528_v24, %v6335_v47  ;;  %v3098_v20 = vadd.f32 %v4528_v24, %v6337_v3  ;;  %v4487_v53 = vpop.f32.mrb[12].mxu0 }
 0x245   : > { %3057 = vst.msk [vmem:[%s6343_s24 + $0x58] sm:$0xff] %vm3045_vm3, %v3024_v10  ;;  %v4529_v35 = vadd.f32 %v4487_v53, %v6326_v48  ;;  %v2875_v13 = vpop.f32.mrb[13].mxu0 }
 0x246   : > { %3056 = vst.msk [vmem:[%s6343_s24 + $0x50] sm:$0xff] %vm3045_vm3, %v3023_v38  ;;  %v4530_v37 = vadd.f32 %v2875_v13, %v6328_v55  ;;  %3174 = vrot.lane.b32.xlu0 %v3099_v12, %s5032_s11  ;;  %3172 = vrot.lane.b32.xlu1 %v3098_v20, %s5032_s11 }
 0x247   : > { %v3026_v39 = vadd.f32 %v4529_v35, %v6335_v47  ;;  %v3101_v17 = vadd.f32 %v4529_v35, %v6337_v3 }
 0x248   : > { %v3025_v60 = vadd.f32 %v4530_v37, %v6335_v47  ;;  %v3100_v44 = vadd.f32 %v4530_v37, %v6337_v3  ;;  %v4490_v0 = vpop.f32.mrb[14].mxu0 }
 0x249   : > { %3059 = vst.msk [vmem:[%s6343_s24 + $0x68] sm:$0xff] %vm3045_vm3, %v3026_v39  ;;  %v4531_v16 = vadd.f32 %v4490_v0, %v6330_v14  ;;  %v2885_v48 = vpop.f32.mrb[15].mxu0 }
 0x24a   : > { %3058 = vst.msk [vmem:[%s6343_s24 + $0x60] sm:$0xff] %vm3045_vm3, %v3025_v60  ;;  %v4532_v55 = vadd.f32 %v2885_v48, %v6332_v34  ;;  %3178 = vrot.lane.b32.xlu0 %v3101_v17, %s5032_s11  ;;  %3176 = vrot.lane.b32.xlu1 %v3100_v44, %s5032_s11 }
 0x24b   : > { %v3028_v42 = vadd.f32 %v4531_v16, %v6335_v47  ;;  %v3103_v11 = vadd.f32 %v4531_v16, %v6337_v3  ;;  %v4293_v46 = vpop.f32.mrb[16].mxu1 }
 0x24c   : > { %v3027_v63 = vadd.f32 %v4532_v55, %v6335_v47  ;;  %v3102_v23 = vadd.f32 %v4532_v55, %v6337_v3  ;;  %v4493_v14 = vpop.f32.mrb[16].mxu0  ;;  %v1825_v56 = vpop.f32.mrb[17].mxu1 }
 0x24d   : > { %3061 = vst.msk [vmem:[%s6343_s24 + $0x78] sm:$0xff] %vm3045_vm3, %v3028_v42  ;;  %v4533_v30 = vadd.f32 %v4493_v14, %v4293_v46  ;;  %v2895_v34 = vpop.f32.mrb[17].mxu0 }
 0x24e   : > { %3060 = vst.msk [vmem:[%s6343_s24 + $0x70] sm:$0xff] %vm3045_vm3, %v3027_v63  ;;  %v4534_v27 = vadd.f32 %v2895_v34, %v1825_v56  ;;  %3182 = vrot.lane.b32.xlu0 %v3103_v11, %s5032_s11  ;;  %3180 = vrot.lane.b32.xlu1 %v3102_v23, %s5032_s11 }
 0x24f   : > { %v3030_v19 = vadd.f32 %v4533_v30, %v6335_v47  ;;  %v3105_v62 = vadd.f32 %v4533_v30, %v6337_v3  ;;  %v4296_v2 = vpop.f32.mrb[18].mxu1 }
 0x250   : > { %v3029_v43 = vadd.f32 %v4534_v27, %v6335_v47  ;;  %v3104_v36 = vadd.f32 %v4534_v27, %v6337_v3  ;;  %v4496_v4 = vpop.f32.mrb[18].mxu0  ;;  %v1835_v61 = vpop.f32.mrb[19].mxu1 }
 0x251   : > { %3063 = vst.msk [vmem:[%s6343_s24 + $0x88] sm:$0xff] %vm3045_vm3, %v3030_v19  ;;  %v4535_v33 = vadd.f32 %v4496_v4, %v4296_v2  ;;  %v2905_v59 = vpop.f32.mrb[19].mxu0 }
 0x252   : > { %3062 = vst.msk [vmem:[%s6343_s24 + $0x80] sm:$0xff] %vm3045_vm3, %v3029_v43  ;;  %v4536_v1 = vadd.f32 %v2905_v59, %v1835_v61  ;;  %3186 = vrot.lane.b32.xlu0 %v3105_v62, %s5032_s11  ;;  %3184 = vrot.lane.b32.xlu1 %v3104_v36, %s5032_s11 }
 0x253   : > { %v3032_v15 = vadd.f32 %v4535_v33, %v6335_v47  ;;  %v3107_v18 = vadd.f32 %v4535_v33, %v6337_v3  ;;  %v4299_v25 = vpop.f32.mrb[20].mxu1 }
 0x254   : > { %v3031_v31 = vadd.f32 %v4536_v1, %v6335_v47  ;;  %v3106_v32 = vadd.f32 %v4536_v1, %v6337_v3  ;;  %v4499_v40 = vpop.f32.mrb[20].mxu0  ;;  %v1845_v41 = vpop.f32.mrb[21].mxu1 }
 0x255   : > { %3065 = vst.msk [vmem:[%s6343_s24 + $0x98] sm:$0xff] %vm3045_vm3, %v3032_v15  ;;  %v4537_v49 = vadd.f32 %v4499_v40, %v4299_v25  ;;  %v2915_v51 = vpop.f32.mrb[21].mxu0 }
 0x256   : > { %3064 = vst.msk [vmem:[%s6343_s24 + $0x90] sm:$0xff] %vm3045_vm3, %v3031_v31  ;;  %v4538_v26 = vadd.f32 %v2915_v51, %v1845_v41  ;;  %3190 = vrot.lane.b32.xlu0 %v3107_v18, %s5032_s11  ;;  %3188 = vrot.lane.b32.xlu1 %v3106_v32, %s5032_s11 }
 0x257   : > { %v3034_v50 = vadd.f32 %v4537_v49, %v6335_v47  ;;  %v3109_v45 = vadd.f32 %v4537_v49, %v6337_v3  ;;  %v4302_v8 = vpop.f32.mrb[22].mxu1 }
 0x258   : > { %v3033_v6 = vadd.f32 %v4538_v26, %v6335_v47  ;;  %v3108_v57 = vadd.f32 %v4538_v26, %v6337_v3  ;;  %v4502_v58 = vpop.f32.mrb[22].mxu0  ;;  %v1855_v5 = vpop.f32.mrb[23].mxu1 }
 0x259   : > { %3067 = vst.msk [vmem:[%s6343_s24 + $0xa8] sm:$0xff] %vm3045_vm3, %v3034_v50  ;;  %v4539_v7 = vadd.f32 %v4502_v58, %v4302_v8  ;;  %v2925_v9 = vpop.f32.mrb[23].mxu0 }
 0x25a   : > { %3066 = vst.msk [vmem:[%s6343_s24 + $0xa0] sm:$0xff] %vm3045_vm3, %v3033_v6  ;;  %v4540_v22 = vadd.f32 %v2925_v9, %v1855_v5  ;;  %3194 = vrot.lane.b32.xlu0 %v3109_v45, %s5032_s11  ;;  %3192 = vrot.lane.b32.xlu1 %v3108_v57, %s5032_s11 }
 0x25b   : > { %v3036_v28 = vadd.f32 %v4539_v7, %v6335_v47  ;;  %v3111_v29 = vadd.f32 %v4539_v7, %v6337_v3  ;;  %v4305_v52 = vpop.f32.mrb[24].mxu1 }
 0x25c   : > { %v3035_v54 = vadd.f32 %v4540_v22, %v6335_v47  ;;  %v3110_v21 = vadd.f32 %v4540_v22, %v6337_v3  ;;  %v4505_v24 = vpop.f32.mrb[24].mxu0  ;;  %v1865_v10 = vpop.f32.mrb[25].mxu1 }
 0x25d   : > { %3069 = vst.msk [vmem:[%s6343_s24 + $0xb8] sm:$0xff] %vm3045_vm3, %v3036_v28  ;;  %v4541_v12 = vadd.f32 %v4505_v24, %v4305_v52  ;;  %v2935_v38 = vpop.f32.mrb[25].mxu0 }
 0x25e   : > { %3068 = vst.msk [vmem:[%s6343_s24 + $0xb0] sm:$0xff] %vm3045_vm3, %v3035_v54  ;;  %v4542_v20 = vadd.f32 %v2935_v38, %v1865_v10  ;;  %3198 = vrot.lane.b32.xlu0 %v3111_v29, %s5032_s11  ;;  %3196 = vrot.lane.b32.xlu1 %v3110_v21, %s5032_s11 }
 0x25f   : > { %v3038_v53 = vadd.f32 %v4541_v12, %v6335_v47  ;;  %v3113_v35 = vadd.f32 %v4541_v12, %v6337_v3  ;;  %v4308_v13 = vpop.f32.mrb[26].mxu1 }
 0x260   : > { %v3037_v37 = vadd.f32 %v4542_v20, %v6335_v47  ;;  %v3112_v39 = vadd.f32 %v4542_v20, %v6337_v3  ;;  %v4508_v17 = vpop.f32.mrb[26].mxu0  ;;  %v1875_v60 = vpop.f32.mrb[27].mxu1 }
 0x261   : > { %3071 = vst.msk [vmem:[%s6343_s24 + $0xc8] sm:$0xff] %vm3045_vm3, %v3038_v53  ;;  %v4543_v44 = vadd.f32 %v4508_v17, %v4308_v13  ;;  %v2945_v0 = vpop.f32.mrb[27].mxu0 }
 0x262   : > { %3070 = vst.msk [vmem:[%s6343_s24 + $0xc0] sm:$0xff] %vm3045_vm3, %v3037_v37  ;;  %v4544_v16 = vadd.f32 %v2945_v0, %v1875_v60  ;;  %3202 = vrot.lane.b32.xlu0 %v3113_v35, %s5032_s11  ;;  %3200 = vrot.lane.b32.xlu1 %v3112_v39, %s5032_s11 }
 0x263   : > { %v3040_v48 = vadd.f32 %v4543_v44, %v6335_v47  ;;  %v3115_v55 = vadd.f32 %v4543_v44, %v6337_v3  ;;  %v4311_v42 = vpop.f32.mrb[28].mxu1 }
 0x264   : > { %v3039_v11 = vadd.f32 %v4544_v16, %v6335_v47  ;;  %v3114_v46 = vadd.f32 %v4544_v16, %v6337_v3  ;;  %v4511_v63 = vpop.f32.mrb[28].mxu0  ;;  %v1885_v23 = vpop.f32.mrb[29].mxu1 }
 0x265   : > { %3073 = vst.msk [vmem:[%s6343_s24 + $0xd8] sm:$0xff] %vm3045_vm3, %v3040_v48  ;;  %v4545_v14 = vadd.f32 %v4511_v63, %v4311_v42  ;;  %v2955_v56 = vpop.f32.mrb[29].mxu0 }
 0x266   : > { %3072 = vst.msk [vmem:[%s6343_s24 + $0xd0] sm:$0xff] %vm3045_vm3, %v3039_v11  ;;  %v4546_v30 = vadd.f32 %v2955_v56, %v1885_v23  ;;  %3206 = vrot.lane.b32.xlu0 %v3115_v55, %s5032_s11  ;;  %3204 = vrot.lane.b32.xlu1 %v3114_v46, %s5032_s11 }
 0x267   : > { %v3042_v34 = vadd.f32 %v4545_v14, %v6335_v47  ;;  %v3117_v27 = vadd.f32 %v4545_v14, %v6337_v3  ;;  %v4314_v19 = vpop.f32.mrb[30].mxu1 }
 0x268   : > { %v3041_v62 = vadd.f32 %v4546_v30, %v6335_v47  ;;  %v3116_v2 = vadd.f32 %v4546_v30, %v6337_v3  ;;  %v4514_v43 = vpop.f32.mrb[30].mxu0  ;;  %v1895_v36 = vpop.f32.mrb[31].mxu1 }
 0x269   : > { %3075 = vst.msk [vmem:[%s6343_s24 + $0xe8] sm:$0xff] %vm3045_vm3, %v3042_v34  ;;  %v4547_v4 = vadd.f32 %v4514_v43, %v4314_v19  ;;  %v2965_v61 = vpop.f32.mrb[31].mxu0 }
 0x26a   : > { %3074 = vst.msk [vmem:[%s6343_s24 + $0xe0] sm:$0xff] %vm3045_vm3, %v3041_v62  ;;  %v4548_v33 = vadd.f32 %v2965_v61, %v1895_v36  ;;  %3210 = vrot.lane.b32.xlu0 %v3117_v27, %s5032_s11  ;;  %3208 = vrot.lane.b32.xlu1 %v3116_v2, %s5032_s11 }
 0x26b   : > { %v3044_v59 = vadd.f32 %v4547_v4, %v6335_v47  ;;  %v3119_v1 = vadd.f32 %v4547_v4, %v6337_v3 }
 0x26c   : > { %v3043_v15 = vadd.f32 %v4548_v33, %v6335_v47  ;;  %v3118_v18 = vadd.f32 %v4548_v33, %v6337_v3 }
 0x26d   : > { %3077 = vst.msk [vmem:[%s6343_s24 + $0xf8] sm:$0xff] %vm3045_vm3, %v3044_v59 }
 0x26e   : > { %3076 = vst.msk [vmem:[%s6343_s24 + $0xf0] sm:$0xff] %vm3045_vm3, %v3043_v15  ;;  %3214 = vrot.lane.b32.xlu0 %v3119_v1, %s5032_s11  ;;  %3212 = vrot.lane.b32.xlu1 %v3118_v18, %s5032_s11 }
 0x2a3   : > { %v3155_v25 = vpop.permute.xlu1 %3154 }
 0x2a4   : > { %3731 = vst.msk [vmem:[%s6343_s24 + $0x108] sm:$0xff] %vm3045_vm3, %v3155_v25  ;;  %v3153_v31 = vpop.permute.xlu0 %3152 }
 0x2a5   : > { %3730 = vst.msk [vmem:[%s6343_s24 + $0x100] sm:$0xff] %vm3045_vm3, %v3153_v31 }
 0x2a8   : > { %v3159_v47 = vpop.permute.xlu0 %3158  ;;  %v3157_v3 = vpop.permute.xlu1 %3156 }
 0x2a9   : > { %3733 = vst.msk [vmem:[%s6343_s24 + $0x118] sm:$0xff] %vm3045_vm3, %v3159_v47  ;;  %3732 = vst.msk [vmem:[%s6343_s24 + $0x110] sm:$0xff] %vm3045_vm3, %v3157_v3 }
 0x2ac   : > { %v3163_v32 = vpop.permute.xlu0 %3162  ;;  %v3161_v40 = vpop.permute.xlu1 %3160 }
 0x2ad   : > { %3735 = vst.msk [vmem:[%s6343_s24 + $0x128] sm:$0xff] %vm3045_vm3, %v3163_v32  ;;  %3734 = vst.msk [vmem:[%s6343_s24 + $0x120] sm:$0xff] %vm3045_vm3, %v3161_v40 }
 0x2b0   : > { %v3167_v41 = vpop.permute.xlu0 %3166  ;;  %v3165_v49 = vpop.permute.xlu1 %3164 }
 0x2b1   : > { %3737 = vst.msk [vmem:[%s6343_s24 + $0x138] sm:$0xff] %vm3045_vm3, %v3167_v41  ;;  %3736 = vst.msk [vmem:[%s6343_s24 + $0x130] sm:$0xff] %vm3045_vm3, %v3165_v49 }
 0x2b4   : > { %v3171_v51 = vpop.permute.xlu0 %3170  ;;  %v3169_v26 = vpop.permute.xlu1 %3168 }
 0x2b5   : > { %3739 = vst.msk [vmem:[%s6343_s24 + $0x148] sm:$0xff] %vm3045_vm3, %v3171_v51  ;;  %3738 = vst.msk [vmem:[%s6343_s24 + $0x140] sm:$0xff] %vm3045_vm3, %v3169_v26 }
 0x2b8   : > { %v3175_v50 = vpop.permute.xlu0 %3174  ;;  %v3173_v45 = vpop.permute.xlu1 %3172 }
 0x2b9   : > { %3741 = vst.msk [vmem:[%s6343_s24 + $0x158] sm:$0xff] %vm3045_vm3, %v3175_v50  ;;  %3740 = vst.msk [vmem:[%s6343_s24 + $0x150] sm:$0xff] %vm3045_vm3, %v3173_v45 }
 0x2bc   : > { %v3179_v8 = vpop.permute.xlu0 %3178  ;;  %v3177_v6 = vpop.permute.xlu1 %3176 }
 0x2bd   : > { %3743 = vst.msk [vmem:[%s6343_s24 + $0x168] sm:$0xff] %vm3045_vm3, %v3179_v8  ;;  %3742 = vst.msk [vmem:[%s6343_s24 + $0x160] sm:$0xff] %vm3045_vm3, %v3177_v6 }
 0x2c0   : > { %v3183_v57 = vpop.permute.xlu0 %3182  ;;  %v3181_v58 = vpop.permute.xlu1 %3180 }
 0x2c1   : > { %3745 = vst.msk [vmem:[%s6343_s24 + $0x178] sm:$0xff] %vm3045_vm3, %v3183_v57  ;;  %3744 = vst.msk [vmem:[%s6343_s24 + $0x170] sm:$0xff] %vm3045_vm3, %v3181_v58 }
 0x2c4   : > { %v3187_v5 = vpop.permute.xlu0 %3186  ;;  %v3185_v7 = vpop.permute.xlu1 %3184 }
 0x2c5   : > { %3747 = vst.msk [vmem:[%s6343_s24 + $0x188] sm:$0xff] %vm3045_vm3, %v3187_v5  ;;  %3746 = vst.msk [vmem:[%s6343_s24 + $0x180] sm:$0xff] %vm3045_vm3, %v3185_v7 }
 0x2c8   : > { %v3191_v9 = vpop.permute.xlu0 %3190  ;;  %v3189_v22 = vpop.permute.xlu1 %3188 }
 0x2c9   : > { %3749 = vst.msk [vmem:[%s6343_s24 + $0x198] sm:$0xff] %vm3045_vm3, %v3191_v9  ;;  %3748 = vst.msk [vmem:[%s6343_s24 + $0x190] sm:$0xff] %vm3045_vm3, %v3189_v22 }
 0x2cc   : > { %v3195_v28 = vpop.permute.xlu0 %3194  ;;  %v3193_v29 = vpop.permute.xlu1 %3192 }
 0x2cd   : > { %3751 = vst.msk [vmem:[%s6343_s24 + $0x1a8] sm:$0xff] %vm3045_vm3, %v3195_v28  ;;  %3750 = vst.msk [vmem:[%s6343_s24 + $0x1a0] sm:$0xff] %vm3045_vm3, %v3193_v29 }
 0x2d0   : > { %v3199_v52 = vpop.permute.xlu0 %3198  ;;  %v3197_v54 = vpop.permute.xlu1 %3196 }
 0x2d1   : > { %3753 = vst.msk [vmem:[%s6343_s24 + $0x1b8] sm:$0xff] %vm3045_vm3, %v3199_v52  ;;  %3752 = vst.msk [vmem:[%s6343_s24 + $0x1b0] sm:$0xff] %vm3045_vm3, %v3197_v54 }
 0x2d4   : > { %v3203_v21 = vpop.permute.xlu0 %3202  ;;  %v3201_v24 = vpop.permute.xlu1 %3200 }
 0x2d5   : > { %3755 = vst.msk [vmem:[%s6343_s24 + $0x1c8] sm:$0xff] %vm3045_vm3, %v3203_v21  ;;  %3754 = vst.msk [vmem:[%s6343_s24 + $0x1c0] sm:$0xff] %vm3045_vm3, %v3201_v24 }
 0x2d8   : > { %v3207_v10 = vpop.permute.xlu0 %3206  ;;  %v3205_v12 = vpop.permute.xlu1 %3204 }
 0x2d9   : > { %3757 = vst.msk [vmem:[%s6343_s24 + $0x1d8] sm:$0xff] %vm3045_vm3, %v3207_v10  ;;  %3756 = vst.msk [vmem:[%s6343_s24 + $0x1d0] sm:$0xff] %vm3045_vm3, %v3205_v12 }
 0x2dc   : > { %v3211_v38 = vpop.permute.xlu0 %3210  ;;  %v3209_v20 = vpop.permute.xlu1 %3208 }
 0x2dd   : > { %3759 = vst.msk [vmem:[%s6343_s24 + $0x1e8] sm:$0xff] %vm3045_vm3, %v3211_v38  ;;  %3758 = vst.msk [vmem:[%s6343_s24 + $0x1e0] sm:$0xff] %vm3045_vm3, %v3209_v20 }
 0x2e0   : > { %v3215_v53 = vpop.permute.xlu0 %3214  ;;  %v3213_v35 = vpop.permute.xlu1 %3212 }
 0x2e1   : > { %3761 = vst.msk [vmem:[%s6343_s24 + $0x1f8] sm:$0xff] %vm3045_vm3, %v3215_v53  ;;  %3760 = vst.msk [vmem:[%s6343_s24 + $0x1f0] sm:$0xff] %vm3045_vm3, %v3213_v35 }
 0x2e2   : > { %s3767_s6 = sshll.u32 %s5014_s15, 12  ;;  %s3313_s9 = sshll.u32 %s6343_s24, 4  ;;  %s3314_s9 = int_to_ptr.vmem [resolvable:$true] %s3313_s9 }
 0x2e3   : > { %s3296_s5 = scalar_lea.hbm %s6617_s3, %s3767_s6  ;;  %s5033_s10 = smov 4096  }
 0x2e4   : > { %p6806_p8 = scmp.ne.s32.totalorder %s6701_s4, 0  ;;  %s5034_s30 = smov 8192  }
 0x2e5   : > { %s5035_s29 = smov 32   ;;  %s5036_s27 = smov 128  }
 0x2e6   : > { %4786 = sst [smem:[#allocation10]] (%p6806_p8), %s5033_s10  ;;  %s5037_s15 = smov 8  }
 0x2e7   : > { %4787 = sst [smem:[#allocation10 + $0x1]] (%p6806_p8), %s5034_s30  ;;  %s5038_s8 = smov [#allocation9]  }
 0x2e8   : > { %4788 = sst [smem:[#allocation10 + $0x2]] (%p6806_p8), %s5035_s29  ;;  %s5039_s26 = smov 0  }
 0x2e9   : > { %4789 = sst [smem:[#allocation10 + $0x3]] (%p6806_p8), %s5036_s27 }
 0x2ea   : > { %4790 = sst [smem:[#allocation10 + $0x4]] (%p6806_p8), %s5036_s27 }
 0x2eb   : > { %4791 = sst [smem:[#allocation10 + $0x5]] (%p6806_p8), %s5037_s15 }
 0x2ec   : > { %4792 = dma.general (%p6806_p8), %s3314_s9, 8192, %s3296_s5, %s3282_s18, %s5038_s8, [#allocation10], %s5039_s26, 0  }
 0x2ed PF: > { %s3341_s21 = sand.u32 1, %s5002_s12   ;;  %p6807_p12 = scmp.ne.s32.totalorder %s6698_s23, 0 }
 0x2ee   : > { %p6808_p1 = scmp.ge.s32.totalorder %s5022_s17, 2  ;;  %s3342_s20 = scalar_lea.sflag [#allocation4], %s3341_s21 }
 0x2f0   : > { %p4806_p10 = pnand %p6808_p1, %p6807_p12 }
 0x2f2   : > { %4997 = dma.done.wait (!%p4806_p10), %s3342_s20, 8192  }
 0x2f3   : > { %4999 = vsyncadd (!%p4806_p10), %s3342_s20, 4294959104  ;;  %s20_s17 = sadd.s32 1, %s5022_s17   ;;  %s6809_s12 = smov %s5006_s13 }
 0x2f4   : > { %p17_p3 = scmp.ge.s32.totalorder %s20_s17, 4   ;;  %s6810_s13 = smov %s5010_s14 }
 0x2f5   : > { %s6811_s14 = smov %s5208_s7  ;;  %s6812_s15 = smov %s5018_s16 }
 0x2f6   : > { %s6813_s16 = smov %s6815_s28  ;;  %19 = sbr.rel (!%p17_p3) target bundleno = 7 (0x7), region = 100 }
 0x2fd   :  { %3347 = vsyncpa [#allocation3], 1 }
 0x2fe   :  { %3349 = vsyncpa [#allocation3 + $0x1], 1 }
 0x2ff   :  { %3350 = vsyncpa [#allocation6], 1 }
 0x300   :  { %3351 = vsyncpa [#allocation4], 1 }
 0x301   :  { %3353 = vsyncpa [#allocation4 + $0x1], 1 }

</bundles_post_ra>
